<compile_context>
chip_gen: v7x
topology: tpu7x:2x2x1
jax: 0.10.0
libtpu: 0.0.40
codegen_flags: <defaults>
</compile_context>

<pallas_src>
import jax
import jax.numpy as jnp
from jax import lax
from jax.experimental import pallas as pl
from jax.experimental.pallas import tpu as pltpu

EPS = 1e-5
NUM_BLOCKS = 3


# ---------------------------------------------------------------------------
# Kernel
# ---------------------------------------------------------------------------
def _make_kernel(act_dtype):
    """act_dtype: dtype of the residual stream between ops (bf16 on v6e/v7x,
    f32 on v5e and older).  LN statistics and dot accumulations are f32."""

    def resmlp_kernel(x_ref, win_ref, bin_ref, *args):
        block_params = args[: 6 * NUM_BLOCKS]
        wout_ref = args[6 * NUM_BLOCKS]        # (1, H)  f32
        bout_ref = args[6 * NUM_BLOCKS + 1]    # (1,)    f32, SMEM scalar
        o_ref = args[6 * NUM_BLOCKS + 2]       # (tb, 1) f32

        wdt = win_ref.dtype  # matmul-input dtype (bf16)

        # input projection: (tb, D) @ (D, H) -> (tb, H), f32 MXU accumulation
        h = jnp.dot(x_ref[...], win_ref[...], preferred_element_type=jnp.float32)
        h = (h + bin_ref[...]).astype(act_dtype)

        # residual blocks (unrolled; NUM_BLOCKS is a compile-time constant)
        for b in range(NUM_BLOCKS):
            w1, b1, w2, b2, g, be = block_params[6 * b: 6 * b + 6]
            # Linear -> ReLU (f32 accumulate, cast once after the ReLU)
            u = jnp.maximum(
                jnp.dot(h.astype(wdt), w1[...],
                        preferred_element_type=jnp.float32) + b1[...],
                0.0,
            ).astype(act_dtype)
            # second Linear of the block (keep f32 for the residual + LN stats)
            v = jnp.dot(u.astype(wdt), w2[...],
                        preferred_element_type=jnp.float32) + b2[...]
            z = h.astype(jnp.float32) + v
            # LayerNorm over the feature axis; centered two-pass variance
            mean = jnp.mean(z, axis=-1, keepdims=True)
            centered = z - mean
            var = jnp.mean(centered * centered, axis=-1, keepdims=True)
            normed = centered * lax.rsqrt(var + EPS)
            # scale/shift + ReLU, then the single cast back to act_dtype
            h = jnp.maximum(normed * g[...] + be[...], 0.0).astype(act_dtype)

        # output projection with out_features == 1: no MXU matvec / transpose,
        # just broadcast-multiply by wout (1, H) and a lane-sum reduce (XLU).
        out = jnp.sum(h.astype(jnp.float32) * wout_ref[...],
                      axis=-1, keepdims=True)
        o_ref[...] = (out + bout_ref[0]).astype(o_ref.dtype)

    return resmlp_kernel


# ---------------------------------------------------------------------------
# Device-aware policy helpers
# ---------------------------------------------------------------------------
def _device_kind():
    try:
        return jax.devices()[0].device_kind.lower()
    except Exception:
        return ""


def _elementwise_dtype():
    """bf16 residual stream on chips with a native bf16 VPU (v6e, v7x);
    f32 elsewhere (v5e/v4 would emulate bf16 elementwise)."""
    kind = _device_kind()
    if "v6" in kind or "v7" in kind:
        return jnp.bfloat16
    return jnp.float32


def _num_parallel_tensorcores():
    """2 on dual-TensorCore chips (v7x), else 1 (v5e / v6e have a single TC)."""
    kind = _device_kind()
    if "v7" in kind or "7x" in kind:
        return 2
    return 1


_MIN_ROWS_PER_CORE_SPLIT = 1024  # only split across TCs when each gets real work


def _pick_batch_tile(B):
    n_tc = _num_parallel_tensorcores()
    if n_tc > 1 and B % n_tc == 0:
        tb = B // n_tc
        # Require a bf16-friendly sublane tile and enough rows per core that
        # the split beats the duplicated weight DMA + per-step grid overhead.
        if tb % 16 == 0 and tb >= _MIN_ROWS_PER_CORE_SPLIT:
            return tb
    return B  # single grid step otherwise


# ---------------------------------------------------------------------------
# Wrapper
# ---------------------------------------------------------------------------
def resmlp_forward(x, params, *, tb=None, weight_dtype=jnp.bfloat16,
                   act_dtype=None):
    """x: (B, input_dim) f32.  params: dict of f32 weights (cast here)."""
    B, D = x.shape
    H = params["win"].shape[1]
    if act_dtype is None:
        act_dtype = _elementwise_dtype()
    if tb is None:
        tb = _pick_batch_tile(B)
    assert B % tb == 0
    grid = B // tb

    wdt = weight_dtype
    # matmul operands in bf16 (f32 accumulation in-kernel); biases/LN in f32
    weights = [params["win"].astype(wdt), params["bin"].astype(jnp.float32)]
    for b in range(NUM_BLOCKS):
        weights += [
            params[f"blk{b}_w1"].astype(wdt),
            params[f"blk{b}_b1"].astype(jnp.float32),
            params[f"blk{b}_w2"].astype(wdt),
            params[f"blk{b}_b2"].astype(jnp.float32),
            params[f"blk{b}_gamma"].astype(jnp.float32),
            params[f"blk{b}_beta"].astype(jnp.float32),
        ]
    # output projection stays f32 (it is a VPU multiply + XLU reduce, not MXU)
    weights += [params["wout"].astype(jnp.float32)]
    bout = params["bout"].reshape(1).astype(jnp.float32)

    def full_spec(arr):
        # whole (small) parameter tensor resident in VMEM for every grid step;
        # constant index_map -> single-buffered (no pipelining needed).
        nd = arr.ndim
        shape = arr.shape
        return pl.BlockSpec(shape, lambda i: (0,) * nd,
                            pipeline_mode=pl.Buffered(1))

    in_specs = (
        [pl.BlockSpec((tb, D), lambda i: (i, 0))]
        + [full_spec(w) for w in weights]
        + [pl.BlockSpec(memory_space=pltpu.MemorySpace.SMEM)]  # bout scalar
    )
    out_spec = pl.BlockSpec((tb, 1), lambda i: (i, 0))

    # advisory cost estimate for the XLA scheduler
    flops = 2 * B * (D * H + NUM_BLOCKS * 2 * H * H + H) \
        + NUM_BLOCKS * B * H * 10  # elementwise / LN passes, rough
    bytes_accessed = (
        B * D * 2                                            # x (bf16)
        + B * 4                                              # output (f32)
        + sum(int(w.size) * w.dtype.itemsize for w in weights)
        + 4                                                  # bout
    )
    cost = pl.CostEstimate(flops=flops,
                           transcendentals=B * NUM_BLOCKS,   # rsqrt per row/block
                           bytes_accessed=bytes_accessed)

    out = pl.pallas_call(
        _make_kernel(act_dtype),
        out_shape=jax.ShapeDtypeStruct((B, 1), jnp.float32),
        grid_spec=pltpu.PrefetchScalarGridSpec(
            num_scalar_prefetch=0,
            grid=(grid,),
            in_specs=in_specs,
            out_specs=out_spec,
        ),
        compiler_params=pltpu.CompilerParams(
            dimension_semantics=("parallel",)),
        cost_estimate=cost,
    )(x.astype(wdt), *weights, bout)

    return out


# ---------------------------------------------------------------------------
# Init (matches ResMLP._init_weights) and pure-JAX reference
# ---------------------------------------------------------------------------
def init_params(key, input_dim, hidden_dim):
    """kaiming_normal(fan_in, relu) => std = sqrt(2 / fan_in); biases zero.
    LayerNorm: gamma = 1, beta = 0.  Hidden weights stored pre-transposed
    (in, out); output projection kept in native PyTorch layout (1, hidden)."""
    keys = jax.random.split(key, 2 + 2 * NUM_BLOCKS)
    p = {}

    def kaiming_t(k, fan_in, fan_out):
        std = (2.0 / fan_in) ** 0.5
        return std * jax.random.normal(k, (fan_in, fan_out), jnp.float32)

    p["win"] = kaiming_t(keys[0], input_dim, hidden_dim)
    p["bin"] = jnp.zeros((1, hidden_dim), jnp.float32)
    for b in range(NUM_BLOCKS):
        p[f"blk{b}_w1"] = kaiming_t(keys[1 + 2 * b], hidden_dim, hidden_dim)
        p[f"blk{b}_b1"] = jnp.zeros((1, hidden_dim), jnp.float32)
        p[f"blk{b}_w2"] = kaiming_t(keys[2 + 2 * b], hidden_dim, hidden_dim)
        p[f"blk{b}_b2"] = jnp.zeros((1, hidden_dim), jnp.float32)
        p[f"blk{b}_gamma"] = jnp.ones((1, hidden_dim), jnp.float32)
        p[f"blk{b}_beta"] = jnp.zeros((1, hidden_dim), jnp.float32)
    std_out = (2.0 / hidden_dim) ** 0.5
    p["wout"] = std_out * jax.random.normal(keys[-1], (1, hidden_dim), jnp.float32)
    p["bout"] = jnp.zeros((1, 1), jnp.float32)
    return p


def resmlp_reference(x, params, *, weight_dtype=jnp.float32,
                     act_dtype=jnp.float32):
    """Pure-JAX reference of the PyTorch forward.  With weight_dtype=bf16 and
    act_dtype matching the kernel it mirrors the kernel math exactly."""
    wdt = weight_dtype

    def mm(a, w):
        return jnp.dot(a.astype(wdt), w.astype(wdt),
                       preferred_element_type=jnp.float32)

    h = (mm(x, params["win"]) + params["bin"]).astype(act_dtype)
    for b in range(NUM_BLOCKS):
        u = jnp.maximum(mm(h, params[f"blk{b}_w1"]) + params[f"blk{b}_b1"],
                        0.0).astype(act_dtype)
        v = mm(u, params[f"blk{b}_w2"]) + params[f"blk{b}_b2"]
        z = h.astype(jnp.float32) + v
        mean = jnp.mean(z, axis=-1, keepdims=True)
        centered = z - mean
        var = jnp.mean(centered * centered, axis=-1, keepdims=True)
        normed = centered * lax.rsqrt(var + EPS)
        h = jnp.maximum(normed * params[f"blk{b}_gamma"]
                        + params[f"blk{b}_beta"], 0.0).astype(act_dtype)
    return (jnp.sum(h.astype(jnp.float32) * params["wout"],
                    axis=-1, keepdims=True) + params["bout"])


# ---------------------------------------------------------------------------
if __name__ == "__main__":
    key = jax.random.PRNGKey(0)
    k_param, k_x = jax.random.split(key)

    B, INPUT_DIM, HIDDEN_DIM = 64, 16, 128
    params = init_params(k_param, INPUT_DIM, HIDDEN_DIM)
    x = jax.random.normal(k_x, (B, INPUT_DIM), jnp.float32)

    out = resmlp_forward(x, params)
    out = jax.block_until_ready(out)
    assert out.shape == (B, 1)

    # Tight check vs a reference that mirrors the kernel's dtype policy.
    act_dtype = _elementwise_dtype()
    ref_matched = resmlp_reference(x, params, weight_dtype=jnp.bfloat16,
                                   act_dtype=act_dtype)
    assert jnp.allclose(out, ref_matched, rtol=2e-2, atol=2e-2), \
        "mismatch vs dtype-matched reference"

    # Loose sanity check vs the full-f32 reference (bf16 rounding only).
    ref_f32 = resmlp_reference(x, params)
    assert jnp.allclose(out, ref_f32, rtol=1e-1, atol=1e-1), \
        "mismatch vs f32 reference"

    print("KERNEL_OK")
</pallas_src>

<mosaic_0001>
module attributes {stable_mosaic.version = 11 : i64} {
  func.func @resmlp_kernel(%arg0: i32, %arg1: memref<64x16xbf16, #tpu.memory_space<vmem>>, %arg2: memref<16x128xbf16, #tpu.memory_space<vmem>>, %arg3: memref<1x128xf32, #tpu.memory_space<vmem>>, %arg4: memref<128x128xbf16, #tpu.memory_space<vmem>>, %arg5: memref<1x128xf32, #tpu.memory_space<vmem>>, %arg6: memref<128x128xbf16, #tpu.memory_space<vmem>>, %arg7: memref<1x128xf32, #tpu.memory_space<vmem>>, %arg8: memref<1x128xf32, #tpu.memory_space<vmem>>, %arg9: memref<1x128xf32, #tpu.memory_space<vmem>>, %arg10: memref<128x128xbf16, #tpu.memory_space<vmem>>, %arg11: memref<1x128xf32, #tpu.memory_space<vmem>>, %arg12: memref<128x128xbf16, #tpu.memory_space<vmem>>, %arg13: memref<1x128xf32, #tpu.memory_space<vmem>>, %arg14: memref<1x128xf32, #tpu.memory_space<vmem>>, %arg15: memref<1x128xf32, #tpu.memory_space<vmem>>, %arg16: memref<128x128xbf16, #tpu.memory_space<vmem>>, %arg17: memref<1x128xf32, #tpu.memory_space<vmem>>, %arg18: memref<128x128xbf16, #tpu.memory_space<vmem>>, %arg19: memref<1x128xf32, #tpu.memory_space<vmem>>, %arg20: memref<1x128xf32, #tpu.memory_space<vmem>>, %arg21: memref<1x128xf32, #tpu.memory_space<vmem>>, %arg22: memref<1x128xf32, #tpu.memory_space<vmem>>, %arg23: memref<1xf32, #tpu.memory_space<smem>>, %arg24: memref<64x1xf32, #tpu.memory_space<vmem>>) attributes {dimension_semantics = [#tpu.dimension_semantics<parallel>], iteration_bounds = array<i64: 1>, scalar_prefetch = 0 : i64, scratch_operands = 0 : i64, tpu.core_type = #tpu.core_type<tc>, window_params = [{transform_indices = @transform_0, window_bounds = array<i64: 64, 16>}, {pipeline_mode = #tpu.pipeline_mode<synchronous>, transform_indices = @transform_1, window_bounds = array<i64: 16, 128>}, {pipeline_mode = #tpu.pipeline_mode<synchronous>, transform_indices = @transform_2, window_bounds = array<i64: 1, 128>}, {pipeline_mode = #tpu.pipeline_mode<synchronous>, transform_indices = @transform_3, window_bounds = array<i64: 128, 128>}, {pipeline_mode = #tpu.pipeline_mode<synchronous>, transform_indices = @transform_4, window_bounds = array<i64: 1, 128>}, {pipeline_mode = #tpu.pipeline_mode<synchronous>, transform_indices = @transform_5, window_bounds = array<i64: 128, 128>}, {pipeline_mode = #tpu.pipeline_mode<synchronous>, transform_indices = @transform_6, window_bounds = array<i64: 1, 128>}, {pipeline_mode = #tpu.pipeline_mode<synchronous>, transform_indices = @transform_7, window_bounds = array<i64: 1, 128>}, {pipeline_mode = #tpu.pipeline_mode<synchronous>, transform_indices = @transform_8, window_bounds = array<i64: 1, 128>}, {pipeline_mode = #tpu.pipeline_mode<synchronous>, transform_indices = @transform_9, window_bounds = array<i64: 128, 128>}, {pipeline_mode = #tpu.pipeline_mode<synchronous>, transform_indices = @transform_10, window_bounds = array<i64: 1, 128>}, {pipeline_mode = #tpu.pipeline_mode<synchronous>, transform_indices = @transform_11, window_bounds = array<i64: 128, 128>}, {pipeline_mode = #tpu.pipeline_mode<synchronous>, transform_indices = @transform_12, window_bounds = array<i64: 1, 128>}, {pipeline_mode = #tpu.pipeline_mode<synchronous>, transform_indices = @transform_13, window_bounds = array<i64: 1, 128>}, {pipeline_mode = #tpu.pipeline_mode<synchronous>, transform_indices = @transform_14, window_bounds = array<i64: 1, 128>}, {pipeline_mode = #tpu.pipeline_mode<synchronous>, transform_indices = @transform_15, window_bounds = array<i64: 128, 128>}, {pipeline_mode = #tpu.pipeline_mode<synchronous>, transform_indices = @transform_16, window_bounds = array<i64: 1, 128>}, {pipeline_mode = #tpu.pipeline_mode<synchronous>, transform_indices = @transform_17, window_bounds = array<i64: 128, 128>}, {pipeline_mode = #tpu.pipeline_mode<synchronous>, transform_indices = @transform_18, window_bounds = array<i64: 1, 128>}, {pipeline_mode = #tpu.pipeline_mode<synchronous>, transform_indices = @transform_19, window_bounds = array<i64: 1, 128>}, {pipeline_mode = #tpu.pipeline_mode<synchronous>, transform_indices = @transform_20, window_bounds = array<i64: 1, 128>}, {pipeline_mode = #tpu.pipeline_mode<synchronous>, transform_indices = @transform_21, window_bounds = array<i64: 1, 128>}, {transform_indices = @transform_22, window_bounds = array<i64: 1>}, {transform_indices = @transform_23, window_bounds = array<i64: 64, 1>}]} {
    %c0 = arith.constant 0 : index
    %c0_0 = arith.constant 0 : index
    %0 = vector.load %arg1[%c0, %c0_0] : memref<64x16xbf16, #tpu.memory_space<vmem>>, vector<64x16xbf16>
    %c0_1 = arith.constant 0 : index
    %c0_2 = arith.constant 0 : index
    %1 = vector.load %arg2[%c0_1, %c0_2] : memref<16x128xbf16, #tpu.memory_space<vmem>>, vector<16x128xbf16>
    %cst = arith.constant dense<0.000000e+00> : vector<64x128xf32>
    %2 = tpu.matmul %0, %1, %cst {dimension_numbers = #tpu.dot_dimension_numbers<[1], [0], [0], [1], [0, 0, 1, 1], [], []>} : vector<64x16xbf16>, vector<16x128xbf16>, vector<64x128xf32> -> vector<64x128xf32>
    %c0_3 = arith.constant 0 : index
    %c0_4 = arith.constant 0 : index
    %3 = vector.load %arg3[%c0_3, %c0_4] : memref<1x128xf32, #tpu.memory_space<vmem>>, vector<1x128xf32>
    %4 = vector.broadcast %3 : vector<1x128xf32> to vector<64x128xf32>
    %5 = arith.addf %2, %4 : vector<64x128xf32>
    %6 = arith.truncf %5 : vector<64x128xf32> to vector<64x128xbf16>
    %c0_5 = arith.constant 0 : index
    %c0_6 = arith.constant 0 : index
    %7 = vector.load %arg4[%c0_5, %c0_6] : memref<128x128xbf16, #tpu.memory_space<vmem>>, vector<128x128xbf16>
    %cst_7 = arith.constant dense<0.000000e+00> : vector<64x128xf32>
    %8 = tpu.matmul %6, %7, %cst_7 {dimension_numbers = #tpu.dot_dimension_numbers<[1], [0], [0], [1], [0, 0, 1, 1], [], []>} : vector<64x128xbf16>, vector<128x128xbf16>, vector<64x128xf32> -> vector<64x128xf32>
    %c0_8 = arith.constant 0 : index
    %c0_9 = arith.constant 0 : index
    %9 = vector.load %arg5[%c0_8, %c0_9] : memref<1x128xf32, #tpu.memory_space<vmem>>, vector<1x128xf32>
    %10 = vector.broadcast %9 : vector<1x128xf32> to vector<64x128xf32>
    %11 = arith.addf %8, %10 : vector<64x128xf32>
    %cst_10 = arith.constant 0.000000e+00 : f32
    %12 = vector.broadcast %cst_10 : f32 to vector<64x128xf32>
    %13 = arith.maximumf %11, %12 : vector<64x128xf32>
    %14 = arith.truncf %13 : vector<64x128xf32> to vector<64x128xbf16>
    %c0_11 = arith.constant 0 : index
    %c0_12 = arith.constant 0 : index
    %15 = vector.load %arg6[%c0_11, %c0_12] : memref<128x128xbf16, #tpu.memory_space<vmem>>, vector<128x128xbf16>
    %cst_13 = arith.constant dense<0.000000e+00> : vector<64x128xf32>
    %16 = tpu.matmul %14, %15, %cst_13 {dimension_numbers = #tpu.dot_dimension_numbers<[1], [0], [0], [1], [0, 0, 1, 1], [], []>} : vector<64x128xbf16>, vector<128x128xbf16>, vector<64x128xf32> -> vector<64x128xf32>
    %c0_14 = arith.constant 0 : index
    %c0_15 = arith.constant 0 : index
    %17 = vector.load %arg7[%c0_14, %c0_15] : memref<1x128xf32, #tpu.memory_space<vmem>>, vector<1x128xf32>
    %18 = vector.broadcast %17 : vector<1x128xf32> to vector<64x128xf32>
    %19 = arith.addf %16, %18 : vector<64x128xf32>
    %20 = arith.addf %5, %19 : vector<64x128xf32>
    %cst_16 = arith.constant dense<0.000000e+00> : vector<64xf32>
    %21 = vector.multi_reduction <add>, %20, %cst_16 [1] : vector<64x128xf32> to vector<64xf32>
    %22 = vector.shape_cast %21 : vector<64xf32> to vector<64x1xf32>
    %cst_17 = arith.constant 1.280000e+02 : f32
    %23 = vector.broadcast %cst_17 : f32 to vector<64x1xf32>
    %24 = arith.divf %22, %23 : vector<64x1xf32>
    %25 = vector.broadcast %24 : vector<64x1xf32> to vector<64x128xf32>
    %26 = arith.subf %20, %25 : vector<64x128xf32>
    %27 = arith.mulf %26, %26 : vector<64x128xf32>
    %cst_18 = arith.constant dense<0.000000e+00> : vector<64xf32>
    %28 = vector.multi_reduction <add>, %27, %cst_18 [1] : vector<64x128xf32> to vector<64xf32>
    %29 = vector.shape_cast %28 : vector<64xf32> to vector<64x1xf32>
    %cst_19 = arith.constant 1.280000e+02 : f32
    %30 = vector.broadcast %cst_19 : f32 to vector<64x1xf32>
    %31 = arith.divf %29, %30 : vector<64x1xf32>
    %cst_20 = arith.constant 9.99999974E-6 : f32
    %32 = vector.broadcast %cst_20 : f32 to vector<64x1xf32>
    %33 = arith.addf %31, %32 : vector<64x1xf32>
    %34 = math.rsqrt %33 : vector<64x1xf32>
    %35 = vector.broadcast %34 : vector<64x1xf32> to vector<64x128xf32>
    %36 = arith.mulf %26, %35 : vector<64x128xf32>
    %c0_21 = arith.constant 0 : index
    %c0_22 = arith.constant 0 : index
    %37 = vector.load %arg8[%c0_21, %c0_22] : memref<1x128xf32, #tpu.memory_space<vmem>>, vector<1x128xf32>
    %38 = vector.broadcast %37 : vector<1x128xf32> to vector<64x128xf32>
    %39 = arith.mulf %36, %38 : vector<64x128xf32>
    %c0_23 = arith.constant 0 : index
    %c0_24 = arith.constant 0 : index
    %40 = vector.load %arg9[%c0_23, %c0_24] : memref<1x128xf32, #tpu.memory_space<vmem>>, vector<1x128xf32>
    %41 = vector.broadcast %40 : vector<1x128xf32> to vector<64x128xf32>
    %42 = arith.addf %39, %41 : vector<64x128xf32>
    %cst_25 = arith.constant 0.000000e+00 : f32
    %43 = vector.broadcast %cst_25 : f32 to vector<64x128xf32>
    %44 = arith.maximumf %42, %43 : vector<64x128xf32>
    %45 = arith.truncf %44 : vector<64x128xf32> to vector<64x128xbf16>
    %c0_26 = arith.constant 0 : index
    %c0_27 = arith.constant 0 : index
    %46 = vector.load %arg10[%c0_26, %c0_27] : memref<128x128xbf16, #tpu.memory_space<vmem>>, vector<128x128xbf16>
    %cst_28 = arith.constant dense<0.000000e+00> : vector<64x128xf32>
    %47 = tpu.matmul %45, %46, %cst_28 {dimension_numbers = #tpu.dot_dimension_numbers<[1], [0], [0], [1], [0, 0, 1, 1], [], []>} : vector<64x128xbf16>, vector<128x128xbf16>, vector<64x128xf32> -> vector<64x128xf32>
    %c0_29 = arith.constant 0 : index
    %c0_30 = arith.constant 0 : index
    %48 = vector.load %arg11[%c0_29, %c0_30] : memref<1x128xf32, #tpu.memory_space<vmem>>, vector<1x128xf32>
    %49 = vector.broadcast %48 : vector<1x128xf32> to vector<64x128xf32>
    %50 = arith.addf %47, %49 : vector<64x128xf32>
    %cst_31 = arith.constant 0.000000e+00 : f32
    %51 = vector.broadcast %cst_31 : f32 to vector<64x128xf32>
    %52 = arith.maximumf %50, %51 : vector<64x128xf32>
    %53 = arith.truncf %52 : vector<64x128xf32> to vector<64x128xbf16>
    %c0_32 = arith.constant 0 : index
    %c0_33 = arith.constant 0 : index
    %54 = vector.load %arg12[%c0_32, %c0_33] : memref<128x128xbf16, #tpu.memory_space<vmem>>, vector<128x128xbf16>
    %cst_34 = arith.constant dense<0.000000e+00> : vector<64x128xf32>
    %55 = tpu.matmul %53, %54, %cst_34 {dimension_numbers = #tpu.dot_dimension_numbers<[1], [0], [0], [1], [0, 0, 1, 1], [], []>} : vector<64x128xbf16>, vector<128x128xbf16>, vector<64x128xf32> -> vector<64x128xf32>
    %c0_35 = arith.constant 0 : index
    %c0_36 = arith.constant 0 : index
    %56 = vector.load %arg13[%c0_35, %c0_36] : memref<1x128xf32, #tpu.memory_space<vmem>>, vector<1x128xf32>
    %57 = vector.broadcast %56 : vector<1x128xf32> to vector<64x128xf32>
    %58 = arith.addf %55, %57 : vector<64x128xf32>
    %59 = arith.addf %44, %58 : vector<64x128xf32>
    %cst_37 = arith.constant dense<0.000000e+00> : vector<64xf32>
    %60 = vector.multi_reduction <add>, %59, %cst_37 [1] : vector<64x128xf32> to vector<64xf32>
    %61 = vector.shape_cast %60 : vector<64xf32> to vector<64x1xf32>
    %cst_38 = arith.constant 1.280000e+02 : f32
    %62 = vector.broadcast %cst_38 : f32 to vector<64x1xf32>
    %63 = arith.divf %61, %62 : vector<64x1xf32>
    %64 = vector.broadcast %63 : vector<64x1xf32> to vector<64x128xf32>
    %65 = arith.subf %59, %64 : vector<64x128xf32>
    %66 = arith.mulf %65, %65 : vector<64x128xf32>
    %cst_39 = arith.constant dense<0.000000e+00> : vector<64xf32>
    %67 = vector.multi_reduction <add>, %66, %cst_39 [1] : vector<64x128xf32> to vector<64xf32>
    %68 = vector.shape_cast %67 : vector<64xf32> to vector<64x1xf32>
    %cst_40 = arith.constant 1.280000e+02 : f32
    %69 = vector.broadcast %cst_40 : f32 to vector<64x1xf32>
    %70 = arith.divf %68, %69 : vector<64x1xf32>
    %cst_41 = arith.constant 9.99999974E-6 : f32
    %71 = vector.broadcast %cst_41 : f32 to vector<64x1xf32>
    %72 = arith.addf %70, %71 : vector<64x1xf32>
    %73 = math.rsqrt %72 : vector<64x1xf32>
    %74 = vector.broadcast %73 : vector<64x1xf32> to vector<64x128xf32>
    %75 = arith.mulf %65, %74 : vector<64x128xf32>
    %c0_42 = arith.constant 0 : index
    %c0_43 = arith.constant 0 : index
    %76 = vector.load %arg14[%c0_42, %c0_43] : memref<1x128xf32, #tpu.memory_space<vmem>>, vector<1x128xf32>
    %77 = vector.broadcast %76 : vector<1x128xf32> to vector<64x128xf32>
    %78 = arith.mulf %75, %77 : vector<64x128xf32>
    %c0_44 = arith.constant 0 : index
    %c0_45 = arith.constant 0 : index
    %79 = vector.load %arg15[%c0_44, %c0_45] : memref<1x128xf32, #tpu.memory_space<vmem>>, vector<1x128xf32>
    %80 = vector.broadcast %79 : vector<1x128xf32> to vector<64x128xf32>
    %81 = arith.addf %78, %80 : vector<64x128xf32>
    %cst_46 = arith.constant 0.000000e+00 : f32
    %82 = vector.broadcast %cst_46 : f32 to vector<64x128xf32>
    %83 = arith.maximumf %81, %82 : vector<64x128xf32>
    %84 = arith.truncf %83 : vector<64x128xf32> to vector<64x128xbf16>
    %c0_47 = arith.constant 0 : index
    %c0_48 = arith.constant 0 : index
    %85 = vector.load %arg16[%c0_47, %c0_48] : memref<128x128xbf16, #tpu.memory_space<vmem>>, vector<128x128xbf16>
    %cst_49 = arith.constant dense<0.000000e+00> : vector<64x128xf32>
    %86 = tpu.matmul %84, %85, %cst_49 {dimension_numbers = #tpu.dot_dimension_numbers<[1], [0], [0], [1], [0, 0, 1, 1], [], []>} : vector<64x128xbf16>, vector<128x128xbf16>, vector<64x128xf32> -> vector<64x128xf32>
    %c0_50 = arith.constant 0 : index
    %c0_51 = arith.constant 0 : index
    %87 = vector.load %arg17[%c0_50, %c0_51] : memref<1x128xf32, #tpu.memory_space<vmem>>, vector<1x128xf32>
    %88 = vector.broadcast %87 : vector<1x128xf32> to vector<64x128xf32>
    %89 = arith.addf %86, %88 : vector<64x128xf32>
    %cst_52 = arith.constant 0.000000e+00 : f32
    %90 = vector.broadcast %cst_52 : f32 to vector<64x128xf32>
    %91 = arith.maximumf %89, %90 : vector<64x128xf32>
    %92 = arith.truncf %91 : vector<64x128xf32> to vector<64x128xbf16>
    %c0_53 = arith.constant 0 : index
    %c0_54 = arith.constant 0 : index
    %93 = vector.load %arg18[%c0_53, %c0_54] : memref<128x128xbf16, #tpu.memory_space<vmem>>, vector<128x128xbf16>
    %cst_55 = arith.constant dense<0.000000e+00> : vector<64x128xf32>
    %94 = tpu.matmul %92, %93, %cst_55 {dimension_numbers = #tpu.dot_dimension_numbers<[1], [0], [0], [1], [0, 0, 1, 1], [], []>} : vector<64x128xbf16>, vector<128x128xbf16>, vector<64x128xf32> -> vector<64x128xf32>
    %c0_56 = arith.constant 0 : index
    %c0_57 = arith.constant 0 : index
    %95 = vector.load %arg19[%c0_56, %c0_57] : memref<1x128xf32, #tpu.memory_space<vmem>>, vector<1x128xf32>
    %96 = vector.broadcast %95 : vector<1x128xf32> to vector<64x128xf32>
    %97 = arith.addf %94, %96 : vector<64x128xf32>
    %98 = arith.addf %83, %97 : vector<64x128xf32>
    %cst_58 = arith.constant dense<0.000000e+00> : vector<64xf32>
    %99 = vector.multi_reduction <add>, %98, %cst_58 [1] : vector<64x128xf32> to vector<64xf32>
    %100 = vector.shape_cast %99 : vector<64xf32> to vector<64x1xf32>
    %cst_59 = arith.constant 1.280000e+02 : f32
    %101 = vector.broadcast %cst_59 : f32 to vector<64x1xf32>
    %102 = arith.divf %100, %101 : vector<64x1xf32>
    %103 = vector.broadcast %102 : vector<64x1xf32> to vector<64x128xf32>
    %104 = arith.subf %98, %103 : vector<64x128xf32>
    %105 = arith.mulf %104, %104 : vector<64x128xf32>
    %cst_60 = arith.constant dense<0.000000e+00> : vector<64xf32>
    %106 = vector.multi_reduction <add>, %105, %cst_60 [1] : vector<64x128xf32> to vector<64xf32>
    %107 = vector.shape_cast %106 : vector<64xf32> to vector<64x1xf32>
    %cst_61 = arith.constant 1.280000e+02 : f32
    %108 = vector.broadcast %cst_61 : f32 to vector<64x1xf32>
    %109 = arith.divf %107, %108 : vector<64x1xf32>
    %cst_62 = arith.constant 9.99999974E-6 : f32
    %110 = vector.broadcast %cst_62 : f32 to vector<64x1xf32>
    %111 = arith.addf %109, %110 : vector<64x1xf32>
    %112 = math.rsqrt %111 : vector<64x1xf32>
    %113 = vector.broadcast %112 : vector<64x1xf32> to vector<64x128xf32>
    %114 = arith.mulf %104, %113 : vector<64x128xf32>
    %c0_63 = arith.constant 0 : index
    %c0_64 = arith.constant 0 : index
    %115 = vector.load %arg20[%c0_63, %c0_64] : memref<1x128xf32, #tpu.memory_space<vmem>>, vector<1x128xf32>
    %116 = vector.broadcast %115 : vector<1x128xf32> to vector<64x128xf32>
    %117 = arith.mulf %114, %116 : vector<64x128xf32>
    %c0_65 = arith.constant 0 : index
    %c0_66 = arith.constant 0 : index
    %118 = vector.load %arg21[%c0_65, %c0_66] : memref<1x128xf32, #tpu.memory_space<vmem>>, vector<1x128xf32>
    %119 = vector.broadcast %118 : vector<1x128xf32> to vector<64x128xf32>
    %120 = arith.addf %117, %119 : vector<64x128xf32>
    %cst_67 = arith.constant 0.000000e+00 : f32
    %121 = vector.broadcast %cst_67 : f32 to vector<64x128xf32>
    %122 = arith.maximumf %120, %121 : vector<64x128xf32>
    %c0_68 = arith.constant 0 : index
    %c0_69 = arith.constant 0 : index
    %123 = vector.load %arg22[%c0_68, %c0_69] : memref<1x128xf32, #tpu.memory_space<vmem>>, vector<1x128xf32>
    %124 = vector.broadcast %123 : vector<1x128xf32> to vector<64x128xf32>
    %125 = arith.mulf %122, %124 : vector<64x128xf32>
    %cst_70 = arith.constant dense<0.000000e+00> : vector<64xf32>
    %126 = vector.multi_reduction <add>, %125, %cst_70 [1] : vector<64x128xf32> to vector<64xf32>
    %127 = vector.shape_cast %126 : vector<64xf32> to vector<64x1xf32>
    %c0_71 = arith.constant 0 : index
    %128 = memref.load %arg23[%c0_71] : memref<1xf32, #tpu.memory_space<smem>>
    %129 = vector.broadcast %128 : f32 to vector<64x1xf32>
    %130 = arith.addf %127, %129 : vector<64x1xf32>
    %c0_72 = arith.constant 0 : index
    %c0_73 = arith.constant 0 : index
    %131 = vector.load %arg24[%c0_72, %c0_73] : memref<64x1xf32, #tpu.memory_space<vmem>>, vector<64x1xf32>
    tpu.vector_store %arg24[%c0_72, %c0_73], %130 {strides = array<i32>} : memref<64x1xf32, #tpu.memory_space<vmem>>, vector<64x1xf32>,
    return
  }
  func.func @transform_0(%arg0: i32) -> (i32, i32) {
    %c0_i32 = arith.constant 0 : i32
    %c0_i32_0 = arith.constant 0 : i32
    return %arg0, %c0_i32 : i32, i32
  }
  func.func @transform_1(%arg0: i32) -> (i32, i32) {
    %c0_i32 = arith.constant 0 : i32
    %c0_i32_0 = arith.constant 0 : i32
    %c0_i32_1 = arith.constant 0 : i32
    return %c0_i32, %c0_i32_0 : i32, i32
  }
  func.func @transform_2(%arg0: i32) -> (i32, i32) {
    %c0_i32 = arith.constant 0 : i32
    %c0_i32_0 = arith.constant 0 : i32
    %c0_i32_1 = arith.constant 0 : i32
    return %c0_i32, %c0_i32_0 : i32, i32
  }
  func.func @transform_3(%arg0: i32) -> (i32, i32) {
    %c0_i32 = arith.constant 0 : i32
    %c0_i32_0 = arith.constant 0 : i32
    %c0_i32_1 = arith.constant 0 : i32
    return %c0_i32, %c0_i32_0 : i32, i32
  }
  func.func @transform_4(%arg0: i32) -> (i32, i32) {
    %c0_i32 = arith.constant 0 : i32
    %c0_i32_0 = arith.constant 0 : i32
    %c0_i32_1 = arith.constant 0 : i32
    return %c0_i32, %c0_i32_0 : i32, i32
  }
  func.func @transform_5(%arg0: i32) -> (i32, i32) {
    %c0_i32 = arith.constant 0 : i32
    %c0_i32_0 = arith.constant 0 : i32
    %c0_i32_1 = arith.constant 0 : i32
    return %c0_i32, %c0_i32_0 : i32, i32
  }
  func.func @transform_6(%arg0: i32) -> (i32, i32) {
    %c0_i32 = arith.constant 0 : i32
    %c0_i32_0 = arith.constant 0 : i32
    %c0_i32_1 = arith.constant 0 : i32
    return %c0_i32, %c0_i32_0 : i32, i32
  }
  func.func @transform_7(%arg0: i32) -> (i32, i32) {
    %c0_i32 = arith.constant 0 : i32
    %c0_i32_0 = arith.constant 0 : i32
    %c0_i32_1 = arith.constant 0 : i32
    return %c0_i32, %c0_i32_0 : i32, i32
  }
  func.func @transform_8(%arg0: i32) -> (i32, i32) {
    %c0_i32 = arith.constant 0 : i32
    %c0_i32_0 = arith.constant 0 : i32
    %c0_i32_1 = arith.constant 0 : i32
    return %c0_i32, %c0_i32_0 : i32, i32
  }
  func.func @transform_9(%arg0: i32) -> (i32, i32) {
    %c0_i32 = arith.constant 0 : i32
    %c0_i32_0 = arith.constant 0 : i32
    %c0_i32_1 = arith.constant 0 : i32
    return %c0_i32, %c0_i32_0 : i32, i32
  }
  func.func @transform_10(%arg0: i32) -> (i32, i32) {
    %c0_i32 = arith.constant 0 : i32
    %c0_i32_0 = arith.constant 0 : i32
    %c0_i32_1 = arith.constant 0 : i32
    return %c0_i32, %c0_i32_0 : i32, i32
  }
  func.func @transform_11(%arg0: i32) -> (i32, i32) {
    %c0_i32 = arith.constant 0 : i32
    %c0_i32_0 = arith.constant 0 : i32
    %c0_i32_1 = arith.constant 0 : i32
    return %c0_i32, %c0_i32_0 : i32, i32
  }
  func.func @transform_12(%arg0: i32) -> (i32, i32) {
    %c0_i32 = arith.constant 0 : i32
    %c0_i32_0 = arith.constant 0 : i32
    %c0_i32_1 = arith.constant 0 : i32
    return %c0_i32, %c0_i32_0 : i32, i32
  }
  func.func @transform_13(%arg0: i32) -> (i32, i32) {
    %c0_i32 = arith.constant 0 : i32
    %c0_i32_0 = arith.constant 0 : i32
    %c0_i32_1 = arith.constant 0 : i32
    return %c0_i32, %c0_i32_0 : i32, i32
  }
  func.func @transform_14(%arg0: i32) -> (i32, i32) {
    %c0_i32 = arith.constant 0 : i32
    %c0_i32_0 = arith.constant 0 : i32
    %c0_i32_1 = arith.constant 0 : i32
    return %c0_i32, %c0_i32_0 : i32, i32
  }
  func.func @transform_15(%arg0: i32) -> (i32, i32) {
    %c0_i32 = arith.constant 0 : i32
    %c0_i32_0 = arith.constant 0 : i32
    %c0_i32_1 = arith.constant 0 : i32
    return %c0_i32, %c0_i32_0 : i32, i32
  }
  func.func @transform_16(%arg0: i32) -> (i32, i32) {
    %c0_i32 = arith.constant 0 : i32
    %c0_i32_0 = arith.constant 0 : i32
    %c0_i32_1 = arith.constant 0 : i32
    return %c0_i32, %c0_i32_0 : i32, i32
  }
  func.func @transform_17(%arg0: i32) -> (i32, i32) {
    %c0_i32 = arith.constant 0 : i32
    %c0_i32_0 = arith.constant 0 : i32
    %c0_i32_1 = arith.constant 0 : i32
    return %c0_i32, %c0_i32_0 : i32, i32
  }
  func.func @transform_18(%arg0: i32) -> (i32, i32) {
    %c0_i32 = arith.constant 0 : i32
    %c0_i32_0 = arith.constant 0 : i32
    %c0_i32_1 = arith.constant 0 : i32
    return %c0_i32, %c0_i32_0 : i32, i32
  }
  func.func @transform_19(%arg0: i32) -> (i32, i32) {
    %c0_i32 = arith.constant 0 : i32
    %c0_i32_0 = arith.constant 0 : i32
    %c0_i32_1 = arith.constant 0 : i32
    return %c0_i32, %c0_i32_0 : i32, i32
  }
  func.func @transform_20(%arg0: i32) -> (i32, i32) {
    %c0_i32 = arith.constant 0 : i32
    %c0_i32_0 = arith.constant 0 : i32
    %c0_i32_1 = arith.constant 0 : i32
    return %c0_i32, %c0_i32_0 : i32, i32
  }
  func.func @transform_21(%arg0: i32) -> (i32, i32) {
    %c0_i32 = arith.constant 0 : i32
    %c0_i32_0 = arith.constant 0 : i32
    %c0_i32_1 = arith.constant 0 : i32
    return %c0_i32, %c0_i32_0 : i32, i32
  }
  func.func @transform_22(%arg0: i32) -> i32 {
    %c0_i32 = arith.constant 0 : i32
    %c0_i32_0 = arith.constant 0 : i32
    return %c0_i32 : i32
  }
  func.func @transform_23(%arg0: i32) -> (i32, i32) {
    %c0_i32 = arith.constant 0 : i32
    %c0_i32_0 = arith.constant 0 : i32
    return %arg0, %c0_i32 : i32, i32
  }
}

</mosaic_0001>

<bundles_post_ra>
// kernel: tpu_custom_call.1
= control target key start
LH: loop header
LB: loop body
LE: loop exit
PB: predicated region body
PF: predicated region fallthrough
CT: control target
= control target key end

     0   :  { %s2715_s0 = inlined_call_operand.vmem [shape: bf16[64,16], index: 0, kind: input, shape index: {}]   ;;  %s2716_s1 = inlined_call_operand.vmem [shape: bf16[16,128], index: 1, kind: input, shape index: {}]   ;;  %s2717_s2 = inlined_call_operand.vmem [shape: f32[1,128], index: 2, kind: input, shape index: {}]   ;;  %s2718_s3 = inlined_call_operand.hbm [shape: bf16[128,128], index: 3, kind: input, shape index: {}]   ;;  %s2719_s4 = inlined_call_operand.vmem [shape: f32[1,128], index: 4, kind: input, shape index: {}]   ;;  %s2720_s5 = inlined_call_operand.hbm [shape: bf16[128,128], index: 5, kind: input, shape index: {}]   ;;  %s2721_s6 = inlined_call_operand.vmem [shape: f32[1,128], index: 6, kind: input, shape index: {}]   ;;  %s2722_s7 = inlined_call_operand.vmem [shape: f32[1,128], index: 7, kind: input, shape index: {}]   ;;  %s2723_s8 = inlined_call_operand.vmem [shape: f32[1,128], index: 8, kind: input, shape index: {}]   ;;  %s2724_s9 = inlined_call_operand.vmem [shape: bf16[128,128], index: 9, kind: input, shape index: {}]   ;;  %s2725_s10 = inlined_call_operand.vmem [shape: f32[1,128], index: 10, kind: input, shape index: {}]   ;;  %s2726_s11 = inlined_call_operand.hbm [shape: bf16[128,128], index: 11, kind: input, shape index: {}]   ;;  %s2727_s12 = inlined_call_operand.vmem [shape: f32[1,128], index: 12, kind: input, shape index: {}]   ;;  %s2728_s13 = inlined_call_operand.vmem [shape: f32[1,128], index: 13, kind: input, shape index: {}]   ;;  %s2729_s14 = inlined_call_operand.vmem [shape: f32[1,128], index: 14, kind: input, shape index: {}]   ;;  %s2730_s15 = inlined_call_operand.hbm [shape: bf16[128,128], index: 15, kind: input, shape index: {}]   ;;  %s2731_s16 = inlined_call_operand.vmem [shape: f32[1,128], index: 16, kind: input, shape index: {}]   ;;  %s2732_s17 = inlined_call_operand.hbm [shape: bf16[128,128], index: 17, kind: input, shape index: {}]   ;;  %s2733_s18 = inlined_call_operand.vmem [shape: f32[1,128], index: 18, kind: input, shape index: {}]   ;;  %s2734_s19 = inlined_call_operand.vmem [shape: f32[1,128], index: 19, kind: input, shape index: {}]   ;;  %s2735_s20 = inlined_call_operand.vmem [shape: f32[1,128], index: 20, kind: input, shape index: {}]   ;;  %s2736_s21 = inlined_call_operand.vmem [shape: f32[1,128], index: 21, kind: input, shape index: {}]   ;;  %s2737_s22 = inlined_call_operand.<no memory space> [shape: f32[1], index: 22, kind: input, shape index: {}]   ;;  %s2738_s23 = inlined_call_operand.vmem [shape: f32[64,1], index: 23, kind: output, shape index: {}]  }
   0x1   :  { %2743 = sst [smem:[#allocation14_spill]] %s2715_s0 }
   0x2   :  { %2744 = sst [smem:[#allocation15_spill]] %s2716_s1 }
   0x3   :  { %2745 = sst [smem:[#allocation16_spill]] %s2717_s2 }
   0x4   :  { %2746 = sst [smem:[#allocation17_spill]] %s2718_s3 }
   0x5   :  { %2747 = sst [smem:[#allocation18_spill]] %s2719_s4 }
   0x6   :  { %2748 = sst [smem:[#allocation19_spill]] %s2720_s5 }
   0x7   :  { %2749 = sst [smem:[#allocation20_spill]] %s2721_s6 }
   0x8   :  { %2750 = sst [smem:[#allocation21_spill]] %s2722_s7 }
   0x9   :  { %2751 = sst [smem:[#allocation22_spill]] %s2737_s22 }
   0xa   :  { %2752 = sst [smem:[#allocation23_spill]] %s2738_s23 }
   0xb   :  { %29 = vsyncpa [#allocation4], 0 }
   0xc   :  { %30 = vsyncpa [#allocation6], 0 }
   0xd   :  { %31 = vsyncpa [#allocation9], 0  ;;  %s2115_s4 = smov [#allocation5]   ;;  %s2116_s24 = smov [#allocation8]  }
   0xe   :  { %s57_s30 = sshll.u32 %s2115_s4, 4  ;;  %s97_s25 = sshll.u32 %s2116_s24, 4  ;;  %s58_s30 = int_to_ptr.vmem [resolvable:$true] %s57_s30  ;;  %s2242_s25 = int_to_ptr.vmem [resolvable:$true] %s97_s25 }
   0xf   :  { %s2753_s26 = sld [smem:[#allocation19_spill]] }
  0x15   :  { %s1999_s2 = scalar_lea.hbm %s2753_s26, 1024 }
  0x16   :  { %p2000_p0 = scmp.ne.s32.totalorder %s2753_s26, %s1999_s2  ;;  %p2003_p1 = scmp.lt.u32.totalorder %s1999_s2, %s2753_s26 }
  0x18   :  { %p2005_p2 = pnand %p2003_p1, %p2000_p0 }
  0x1a   :  { %2008 = shalt.err (!%p2005_p2)
}
  0x1b   :  { %s2009_s29 = scalar_lea.vmem %s58_s30, 1024  ;;  %p2014_p4 = scmp.lt.s32.totalorder %s58_s30, %s58_s30 }
  0x1c   :  { %p2010_p3 = scmp.ne.s32.totalorder %s58_s30, %s2009_s29  ;;  %p2015_p5 = scmp.lt.s32.totalorder %s2009_s29, %s2009_s29 }
  0x1e   :  { %p2016_p6 = por %p2015_p5, %p2014_p4 }
  0x20   :  { %p2017_p7 = pnand %p2016_p6, %p2010_p3 }
  0x22   :  { %2020 = shalt.err (!%p2017_p7)
}
  0x23   :  { %s2117_s3 = smov 64   ;;  %s2118_s0 = smov 4  }
  0x24   :  { %63 = dma.hbm_to_vmem [thread:$0]  %s2753_s26, 1024, %s58_s30, [#allocation6], %s2117_s3, %s2117_s3, %s2118_s0  }
  0x25   :  { %s2021_s2 = scalar_lea.hbm %s2730_s15, 1024 }
  0x26   :  { %p2022_p8 = scmp.ne.s32.totalorder %s2730_s15, %s2021_s2  ;;  %p2025_p9 = scmp.lt.u32.totalorder %s2021_s2, %s2730_s15 }
  0x28   :  { %p2027_p10 = pnand %p2025_p9, %p2022_p8 }
  0x2a   :  { %2030 = shalt.err (!%p2027_p10)
}
  0x2b   :  { %s2031_s29 = scalar_lea.vmem %s2242_s25, 1024  ;;  %p2036_p12 = scmp.lt.s32.totalorder %s2242_s25, %s2242_s25 }
  0x2c   :  { %p2032_p11 = scmp.ne.s32.totalorder %s2242_s25, %s2031_s29  ;;  %p2037_p13 = scmp.lt.s32.totalorder %s2031_s29, %s2031_s29 }
  0x2e   :  { %p2038_p0 = por %p2037_p13, %p2036_p12 }
  0x30   :  { %p2039_p1 = pnand %p2038_p0, %p2032_p11 }
  0x32   :  { %2042 = shalt.err (!%p2039_p1)
}
  0x33   :  { %103 = dma.hbm_to_vmem [thread:$0]  %s2730_s15, 1024, %s2242_s25, [#allocation9], %s2117_s3, %s2117_s3, %s2118_s0  }
  0x34   :  { %s2119_s4 = smov [#allocation3]   ;;  %s2120_s5 = smov [#allocation7]  }
  0x35   :  { %s43_s24 = sshll.u32 %s2119_s4, 4  ;;  %s79_s1 = sshll.u32 %s2120_s5, 4  ;;  %s44_s24 = int_to_ptr.vmem [resolvable:$true] %s43_s24  ;;  %s2279_s1 = int_to_ptr.vmem [resolvable:$true] %s79_s1 }
  0x36   :  { %s2754_s27 = sld [smem:[#allocation17_spill]] }
  0x3c   :  { %s2043_s7 = scalar_lea.hbm %s2754_s27, 1024 }
  0x3d   :  { %p2044_p2 = scmp.ne.s32.totalorder %s2754_s27, %s2043_s7  ;;  %p2047_p3 = scmp.lt.u32.totalorder %s2043_s7, %s2754_s27 }
  0x3f   :  { %p2049_p4 = pnand %p2047_p3, %p2044_p2 }
  0x41   :  { %2052 = shalt.err (!%p2049_p4)
}
  0x42   :  { %s2053_s15 = scalar_lea.vmem %s44_s24, 1024  ;;  %p2058_p6 = scmp.lt.s32.totalorder %s44_s24, %s44_s24 }
  0x43   :  { %p2054_p5 = scmp.ne.s32.totalorder %s44_s24, %s2053_s15  ;;  %p2059_p7 = scmp.lt.s32.totalorder %s2053_s15, %s2053_s15 }
  0x45   :  { %p2060_p8 = por %p2059_p7, %p2058_p6 }
  0x47   :  { %p2061_p9 = pnand %p2060_p8, %p2054_p5 }
  0x49   :  { %2064 = shalt.err (!%p2061_p9)
}
  0x4a   :  { %49 = dma.hbm_to_vmem [thread:$0]  %s2754_s27, 1024, %s44_s24, [#allocation4], %s2117_s3, %s2117_s3, %s2118_s0  }
  0x4b   :  { %s2065_s22 = scalar_lea.hbm %s2726_s11, 1024 }
  0x4c   :  { %p2066_p10 = scmp.ne.s32.totalorder %s2726_s11, %s2065_s22  ;;  %p2069_p11 = scmp.lt.u32.totalorder %s2065_s22, %s2726_s11 }
  0x4e   :  { %p2071_p12 = pnand %p2069_p11, %p2066_p10 }
  0x50   :  { %2074 = shalt.err (!%p2071_p12)
}
  0x51   :  { %s2075_s7 = scalar_lea.vmem %s2279_s1, 1024  ;;  %p2080_p0 = scmp.lt.s32.totalorder %s2279_s1, %s2279_s1 }
  0x52   :  { %p2076_p13 = scmp.ne.s32.totalorder %s2279_s1, %s2075_s7  ;;  %p2081_p1 = scmp.lt.s32.totalorder %s2075_s7, %s2075_s7 }
  0x54   :  { %p2082_p2 = por %p2081_p1, %p2080_p0 }
  0x56   :  { %p2083_p3 = pnand %p2082_p2, %p2076_p13 }
  0x58   :  { %2086 = shalt.err (!%p2083_p3)
}
  0x59   :  { %85 = dma.hbm_to_vmem [thread:$0]  %s2726_s11, 1024, %s2279_s1, [#allocation6], %s2117_s3, %s2117_s3, %s2118_s0  }
  0x5a   :  { %s2121_s28 = smov [#allocation10]   ;;  %s2087_s30 = scalar_lea.hbm %s2732_s17, 1024 }
  0x5b   :  { %s111_s29 = sshll.u32 %s2121_s28, 4  ;;  %p2088_p4 = scmp.ne.s32.totalorder %s2732_s17, %s2087_s30  ;;  %s112_s29 = int_to_ptr.vmem [resolvable:$true] %s111_s29 }
  0x5c   :  { %p2091_p5 = scmp.lt.u32.totalorder %s2087_s30, %s2732_s17 }
  0x5e   :  { %p2093_p6 = pnand %p2091_p5, %p2088_p4 }
  0x60   :  { %2096 = shalt.err (!%p2093_p6)
}
  0x61   :  { %s2097_s5 = scalar_lea.vmem %s112_s29, 1024  ;;  %p2102_p8 = scmp.lt.s32.totalorder %s112_s29, %s112_s29 }
  0x62   :  { %p2098_p7 = scmp.ne.s32.totalorder %s112_s29, %s2097_s5  ;;  %p2103_p9 = scmp.lt.s32.totalorder %s2097_s5, %s2097_s5 }
  0x64   :  { %p2104_p10 = por %p2103_p9, %p2102_p8 }
  0x66   :  { %p2105_p11 = pnand %p2104_p10, %p2098_p7 }
  0x68   :  { %2108 = shalt.err (!%p2105_p11)
}
  0x69   :  { %117 = dma.hbm_to_vmem [thread:$0]  %s2732_s17, 1024, %s112_s29, [#allocation9], %s2117_s3, %s2117_s3, %s2118_s0  }
  0x6a   :  { %2109 = dma.done.wait [#allocation4], 1024  }
  0x6b   :  { %2110 = vsyncadd [#allocation4], 4294966272 }
  0x6c   :  { %2111 = dma.done.wait [#allocation6], 2048  }
  0x6d   :  { %2112 = vsyncadd [#allocation6], 4294965248 }
  0x6e   :  { %2113 = dma.done.wait [#allocation9], 2048  }
  0x6f   :  { %2114 = vsyncadd [#allocation9], 4294965248  ;;  %s2755_s7 = sld [smem:[#allocation15_spill]]  ;;  %vm187_vm0 = vcmask 130048   ;;  %s2756_s28 = sld [smem:[#allocation14_spill]]  ;;  %v1903_v4 = vld [vmem:[#allocation3] sm:$0xff]  }
  0x70   :  { %v1904_v5 = vld [vmem:[#allocation3 + $0x8] sm:$0xff]   ;;  %1747 = vmatprep.subr.bf16.mxu1 %v1903_v4  ;;  %v1905_v6 = vld [vmem:[#allocation3 + $0x10] sm:$0xff]   ;;  %v1906_v8 = vld [vmem:[#allocation3 + $0x18] sm:$0xff]   ;;  %s2757_s4 = sld [smem:[#allocation16_spill]]  ;;  %s2758_s5 = sld [smem:[#allocation18_spill]]  ;;  %vm1573_vm1 = vcmask 7168  }
  0x71   :  { %1748 = vmatpush3.bf16.msra.mxu1 %v1903_v4  ;;  %v1907_v9 = vld [vmem:[#allocation3 + $0x20] sm:$0xff]   ;;  %v1908_v10 = vld [vmem:[#allocation3 + $0x28] sm:$0xff]   ;;  %v1909_v11 = vld [vmem:[#allocation3 + $0x30] sm:$0xff]   ;;  %s2759_s2 = sld [smem:[#allocation20_spill]]  ;;  %s2760_s11 = sld [smem:[#allocation21_spill]] }
  0x72   :  { %1749 = vmatprep.subr.bf16.mxu1 %v1904_v5  ;;  %v1910_v12 = vld [vmem:[#allocation3 + $0x38] sm:$0xff]   ;;  %v1911_v13 = vld [vmem:[#allocation5] sm:$0xff]   ;;  %v1912_v14 = vld [vmem:[#allocation5 + $0x8] sm:$0xff]   ;;  %s2761_s29 = sld [smem:[#allocation22_spill]] }
  0x73   :  { %v1913_v15 = vld [vmem:[#allocation5 + $0x10] sm:$0xff]   ;;  %v1914_v16 = vld [vmem:[#allocation5 + $0x18] sm:$0xff]   ;;  %v1915_v17 = vld [vmem:[#allocation5 + $0x20] sm:$0xff]  }
  0x74   :  { %v1916_v18 = vld [vmem:[#allocation5 + $0x28] sm:$0xff]   ;;  %v1917_v40 = vld [vmem:[#allocation5 + $0x30] sm:$0xff]   ;;  %v1918_v41 = vld [vmem:[#allocation5 + $0x38] sm:$0xff]  }
  0x75   :  { %v1898_v0 = vld [vmem:[%s2755_s7] sm:$0xff]   ;;  %v1900_v2 = vld [vmem:[%s2756_s28 + $0x8] sm:$0xff]   ;;  %v1901_v3 = vld [vmem:[%s2756_s28 + $0x10] sm:$0xff]   ;;  %1750 = vmatpush3.bf16.msra.mxu1 %v1904_v5 }
  0x76   :  { %v1899_v1 = vld [vmem:[%s2756_s28] sm:$0xff]   ;;  %1737 = vmatprep.subr.bf16.mxu0 %v1898_v0  ;;  %v1902_v7 = vld [vmem:[%s2756_s28 + $0x18] sm:$0xff]   ;;  %1751 = vmatprep.subr.bf16.mxu1 %v1905_v6 }
  0x77   :  { %1738 = vmatpush3.bf16.msra.mxu0 %v1898_v0  ;;  %1739 = vmatprep.mubr.msk.bf16.mxu0 %vm187_vm0, %v1899_v1  ;;  %v1589_v20 = vld [vmem:[%s2757_s4] ss:$0 sm:$0xff]  ;;  %s2762_s4 = sld [smem:[#allocation23_spill]] }
  0x78   :  { %1771 = vmatprep.subr.bf16.mxu0 %v1911_v13  ;;  %v1599_v42 = vld [vmem:[%s2758_s5] ss:$0 sm:$0xff] }
  0x79   :  { %1752 = vmatpush3.bf16.msra.mxu1 %v1905_v6 }
  0x7a   :  { %1740 = vmatmul.mubr.msk.bf16.vlgmr.msra.gmra.mrb[0].mxu0 %vm187_vm0, %v1900_v2  ;;  %1753 = vmatprep.subr.bf16.mxu1 %v1906_v8 }
  0x7b   :  { %1743 = vmatprep.mubr.msk.bf16.mxu0 %vm187_vm0, %v1901_v3  ;;  %1772 = vmatpush3.bf16.msra.mxu0 %v1911_v13 }
  0x7c   :  { %1773 = vmatprep.subr.bf16.mxu0 %v1912_v14 }
  0x7d   :  { %1754 = vmatpush3.bf16.msra.mxu1 %v1906_v8 }
  0x7e   :  { %1755 = vmatprep.subr.bf16.mxu1 %v1907_v9 }
  0x7f   :  { %1774 = vmatpush3.bf16.msra.mxu0 %v1912_v14 }
  0x80   :  { %1775 = vmatprep.subr.bf16.mxu0 %v1913_v15 }
  0x81   :  { %1756 = vmatpush3.bf16.msra.mxu1 %v1907_v9 }
  0x82   :  { %1744 = vmatmul.mubr.msk.bf16.gmra.mrb[4].mxu0 %vm187_vm0, %v1902_v7  ;;  %1757 = vmatprep.subr.bf16.mxu1 %v1908_v10  ;;  %v1608_v7 = vld [vmem:[%s2759_s2] ss:$0 sm:$0xff] }
  0x83   :  { %1776 = vmatpush3.bf16.msra.mxu0 %v1913_v15 }
  0x84   :  { %1777 = vmatprep.subr.bf16.mxu0 %v1914_v16 }
  0x85   :  { %1758 = vmatpush3.bf16.msra.mxu1 %v1908_v10 }
  0x86   :  { %1759 = vmatprep.subr.bf16.mxu1 %v1909_v11 }
  0x87   :  { %1778 = vmatpush3.bf16.msra.mxu0 %v1914_v16 }
  0x88   :  { %1779 = vmatprep.subr.bf16.mxu0 %v1915_v17 }
  0x89   :  { %1760 = vmatpush3.bf16.msra.mxu1 %v1909_v11 }
  0x8a   :  { %1761 = vmatprep.subr.bf16.mxu1 %v1910_v12 }
  0x8b   :  { %1780 = vmatpush3.bf16.msra.mxu0 %v1915_v17 }
  0x8c   :  { %1781 = vmatprep.subr.bf16.mxu0 %v1916_v18 }
  0x8d   :  { %1762 = vmatpush3.bf16.msra.mxu1 %v1910_v12 }
  0x8f   :  { %1782 = vmatpush3.bf16.msra.mxu0 %v1916_v18 }
  0x90   :  { %1783 = vmatprep.subr.bf16.mxu0 %v1917_v40 }
  0x93   :  { %1784 = vmatpush3.bf16.msra.mxu0 %v1917_v40 }
  0x94   :  { %1785 = vmatprep.subr.bf16.mxu0 %v1918_v41 }
  0x97   :  { %1786 = vmatpush3.bf16.msra.mxu0 %v1918_v41 }
 0x14d   :  { %v1741_v19 = vpop.f32.mrb[0].mxu0 }
 0x14e   :  { %v234_v21 = vpop.f32.mrb[1].mxu0  ;;  %v2359_v27 = vadd.f32 %v1741_v19, %v1589_v20 }
 0x14f   :  { %v1742_v22 = vpop.f32.mrb[2].mxu0  ;;  %v2355_v25 = vadd.f32 %v1589_v20, %v234_v21 }
 0x150   :  { %v2353_v23 = vadd.f32 %v1742_v22, %v1589_v20  ;;  %v237_v24 = vpop.f32.mrb[3].mxu0 }
 0x151   :  { %v2357_v26 = vadd.f32 %v1589_v20, %v237_v24 }
 0x152   :  { %v266_v29 = vpack.c.bf16 %v2353_v23, %v2359_v27 }
 0x153   :  { %v265_v28 = vpack.c.bf16 %v2357_v26, %v2355_v25 }
 0x155   :  { %v1745_v30 = vpop.f32.mrb[4].mxu0  ;;  %1763 = vmatprep.mubr.bf16.mxu1 %v265_v28 }
 0x156   :  { %v250_v31 = vpop.f32.mrb[5].mxu0  ;;  %1764 = vmatmul.mubr.bf16.vlgmr.msra.gmra.mrb[0].mxu1 %v266_v29  ;;  %v2367_v34 = vadd.f32 %v1745_v30, %v1589_v20 }
 0x157   :  { %v2365_v32 = vadd.f32 %v1589_v20, %v250_v31  ;;  %v1746_v33 = vpop.f32.mrb[6].mxu0 }
 0x158   :  { %v2369_v35 = vadd.f32 %v1746_v33, %v1589_v20  ;;  %v253_v36 = vpop.f32.mrb[7].mxu0 }
 0x159   :  { %v2371_v37 = vadd.f32 %v1589_v20, %v253_v36 }
 0x15a   :  { %v268_v39 = vpack.c.bf16 %v2369_v35, %v2367_v34 }
 0x15b   :  { %v267_v38 = vpack.c.bf16 %v2371_v37, %v2365_v32 }
 0x15d   :  { %1767 = vmatprep.mubr.bf16.mxu1 %v267_v38 }
 0x15e   :  { %1768 = vmatmul.mubr.bf16.gmra.mrb[4].mxu1 %v268_v39 }
 0x229   :  { %v1765_v43 = vpop.f32.mrb[0].mxu1 }
 0x22a   :  { %v383_v44 = vadd.f32 %v1765_v43, %v1599_v42  ;;  %v374_v45 = vpop.f32.mrb[1].mxu1 }
 0x22b   :  { %v375_v46 = vadd.f32 %v1599_v42, %v374_v45  ;;  %v1766_v47 = vpop.f32.mrb[2].mxu1 }
 0x22c   :  { %v386_v48 = vadd.f32 %v1766_v47, %v1599_v42  ;;  %v377_v49 = vpop.f32.mrb[3].mxu1  ;;  %v407_v51 = vmax.f32 %v383_v44, 0.0 }
 0x22d   :  { %v378_v50 = vadd.f32 %v1599_v42, %v377_v49  ;;  %v405_v53 = vmax.f32 %v375_v46, 0.0 }
 0x22e   :  { %v408_v52 = vmax.f32 %v386_v48, 0.0 }
 0x22f   :  { %v406_v54 = vmax.f32 %v378_v50, 0.0 }
 0x230   :  { %v414_v55 = vpack.c.bf16 %v408_v52, %v407_v51 }
 0x231   :  { %v413_v56 = vpack.c.bf16 %v406_v54, %v405_v53  ;;  %v1769_v57 = vpop.f32.mrb[4].mxu1 }
 0x232   :  { %v399_v58 = vadd.f32 %v1769_v57, %v1599_v42  ;;  %v390_v59 = vpop.f32.mrb[5].mxu1 }
 0x233   :  { %v391_v60 = vadd.f32 %v1599_v42, %v390_v59  ;;  %v1770_v61 = vpop.f32.mrb[6].mxu1  ;;  %1787 = vmatprep.mubr.bf16.mxu0 %v413_v56 }
 0x234   :  { %v402_v62 = vadd.f32 %v1770_v61, %v1599_v42  ;;  %v393_v63 = vpop.f32.mrb[7].mxu1  ;;  %1788 = vmatmul.mubr.bf16.vlgmr.msra.gmra.mrb[8].mxu0 %v414_v55  ;;  %v411_v1 = vmax.f32 %v399_v58, 0.0 }
 0x235   :  { %v394_v0 = vadd.f32 %v1599_v42, %v393_v63  ;;  %v409_v3 = vmax.f32 %v391_v60, 0.0  ;;  %v1919_v63 = vld [vmem:[%s2724_s9] sm:$0xff]  }
 0x236   :  { %v412_v2 = vmax.f32 %v402_v62, 0.0  ;;  %1795 = vmatprep.subr.bf16.mxu1 %v1919_v63 }
 0x237   :  { %v410_v4 = vmax.f32 %v394_v0, 0.0  ;;  %1796 = vmatpush3.bf16.msra.mxu1 %v1919_v63 }
 0x238   :  { %v416_v5 = vpack.c.bf16 %v412_v2, %v411_v1  ;;  %v1920_v1 = vld [vmem:[%s2724_s9 + $0x8] sm:$0xff]   ;;  %v1921_v2 = vld [vmem:[%s2724_s9 + $0x10] sm:$0xff]  }
 0x239   :  { %v415_v6 = vpack.c.bf16 %v410_v4, %v409_v3  ;;  %1797 = vmatprep.subr.bf16.mxu1 %v1920_v1  ;;  %v1922_v3 = vld [vmem:[%s2724_s9 + $0x18] sm:$0xff]   ;;  %v1923_v4 = vld [vmem:[%s2724_s9 + $0x20] sm:$0xff]  }
 0x23b   :  { %1791 = vmatprep.mubr.bf16.mxu0 %v415_v6  ;;  %1798 = vmatpush3.bf16.msra.mxu1 %v1920_v1  ;;  %v1925_v6 = vld [vmem:[%s2724_s9 + $0x30] sm:$0xff]  }
 0x23c   :  { %1792 = vmatmul.mubr.bf16.gmra.mrb[12].mxu0 %v416_v5  ;;  %1799 = vmatprep.subr.bf16.mxu1 %v1921_v2  ;;  %v1924_v5 = vld [vmem:[%s2724_s9 + $0x28] sm:$0xff]  }
 0x23f   :  { %1800 = vmatpush3.bf16.msra.mxu1 %v1921_v2 }
 0x240   :  { %1801 = vmatprep.subr.bf16.mxu1 %v1922_v3 }
 0x243   :  { %1802 = vmatpush3.bf16.msra.mxu1 %v1922_v3 }
 0x244   :  { %1803 = vmatprep.subr.bf16.mxu1 %v1923_v4 }
 0x247   :  { %1804 = vmatpush3.bf16.msra.mxu1 %v1923_v4 }
 0x248   :  { %1805 = vmatprep.subr.bf16.mxu1 %v1924_v5 }
 0x24b   :  { %1806 = vmatpush3.bf16.msra.mxu1 %v1924_v5 }
 0x24c   :  { %1807 = vmatprep.subr.bf16.mxu1 %v1925_v6 }
 0x24f   :  { %1808 = vmatpush3.bf16.msra.mxu1 %v1925_v6 }
 0x307   :  { %v1789_v8 = vpop.f32.mrb[8].mxu0 }
 0x308   :  { %v531_v9 = vadd.f32 %v1789_v8, %v1608_v7  ;;  %v522_v10 = vpop.f32.mrb[9].mxu0  ;;  %v1927_v8 = vld [vmem:[#allocation7] sm:$0xff]  }
 0x309   :  { %v523_v11 = vadd.f32 %v1608_v7, %v522_v10  ;;  %v1790_v12 = vpop.f32.mrb[10].mxu0  ;;  %1819 = vmatprep.subr.bf16.mxu0 %v1927_v8  ;;  %v1929_v10 = vld [vmem:[#allocation7 + $0x10] sm:$0xff]  }
 0x30a   :  { %v534_v13 = vadd.f32 %v1790_v12, %v1608_v7  ;;  %v525_v14 = vpop.f32.mrb[11].mxu0  ;;  %v555_v15 = vadd.f32 %v531_v9, %v2359_v27  ;;  %v1928_v9 = vld [vmem:[#allocation7 + $0x8] sm:$0xff]   ;;  %1820 = vmatpush3.bf16.msra.mxu0 %v1927_v8  ;;  %v1931_v12 = vld [vmem:[#allocation7 + $0x20] sm:$0xff]  }
 0x30b   :  { %v526_v16 = vadd.f32 %v1608_v7, %v525_v14  ;;  %v553_v17 = vadd.f32 %v523_v11, %v2355_v25  ;;  %1821 = vmatprep.subr.bf16.mxu0 %v1928_v9  ;;  %v1930_v11 = vld [vmem:[#allocation7 + $0x18] sm:$0xff]  }
 0x30c   :  { %565 = vadd.xlane.f32.xlu1 %v555_v15  ;;  %v556_v18 = vadd.f32 %v534_v13, %v2353_v23  ;;  %v1932_v13 = vld [vmem:[#allocation7 + $0x28] sm:$0xff]  }
 0x30d   :  { %561 = vadd.xlane.f32.xlu0 %v553_v17  ;;  %v554_v20 = vadd.f32 %v526_v16, %v2357_v26 }
 0x30e   :  { %1822 = vmatpush3.bf16.msra.mxu0 %v1928_v9 }
 0x30f   :  { %v1793_v19 = vpop.f32.mrb[12].mxu0  ;;  %1823 = vmatprep.subr.bf16.mxu0 %v1929_v10 }
 0x310   :  { %567 = vadd.xlane.f32.xlu1 %v556_v18  ;;  %v538_v21 = vpop.f32.mrb[13].mxu0  ;;  %v547_v29 = vadd.f32 %v1793_v19, %v1608_v7 }
 0x311   :  { %v539_v22 = vadd.f32 %v1608_v7, %v538_v21  ;;  %v1794_v24 = vpop.f32.mrb[14].mxu0  ;;  %563 = vadd.xlane.f32.xlu0 %v554_v20 }
 0x312   :  { %v541_v28 = vpop.f32.mrb[15].mxu0  ;;  %v550_v31 = vadd.f32 %v1794_v24, %v1608_v7  ;;  %v559_v23 = vadd.f32 %v547_v29, %v2367_v34  ;;  %1824 = vmatpush3.bf16.msra.mxu0 %v1929_v10 }
 0x313   :  { %v542_v30 = vadd.f32 %v1608_v7, %v541_v28  ;;  %v557_v27 = vadd.f32 %v539_v22, %v2365_v32  ;;  %v1926_v7 = vld [vmem:[%s2724_s9 + $0x38] sm:$0xff]   ;;  %1825 = vmatprep.subr.bf16.mxu0 %v1930_v11 }
 0x314   :  { %v560_v26 = vadd.f32 %v550_v31, %v2369_v35  ;;  %1809 = vmatprep.subr.bf16.mxu1 %v1926_v7 }
 0x315   :  { %569 = vadd.xlane.f32.xlu0 %v557_v27  ;;  %v558_v25 = vadd.f32 %v542_v30, %v2371_v37  ;;  %1810 = vmatpush3.bf16.msra.mxu1 %v1926_v7 }
 0x316   :  { %1826 = vmatpush3.bf16.msra.mxu0 %v1930_v11 }
 0x317   :  { %571 = vadd.xlane.f32.xlu1 %v558_v25  ;;  %1827 = vmatprep.subr.bf16.mxu0 %v1931_v12 }
 0x319   :  { %573 = vadd.xlane.f32.xlu0 %v559_v23 }
 0x31a   :  { %1828 = vmatpush3.bf16.msra.mxu0 %v1931_v12 }
 0x31b   :  { %575 = vadd.xlane.f32.xlu1 %v560_v26  ;;  %1829 = vmatprep.subr.bf16.mxu0 %v1932_v13 }
 0x31e   :  { %1830 = vmatpush3.bf16.msra.mxu0 %v1932_v13 }
 0x399   :  { %v566_v33 = vpop.xlane.xlu1 %565 }
 0x39a   :  { %v562_v36 = vpop.xlane.xlu0 %561  ;;  %v580_v38 = vmul.f32 0.0078125, %v566_v33 }
 0x39b   :  { %v578_v39 = vmul.f32 0.0078125, %v562_v36 }
 0x39c   :  { %v2393_v32 = vsub.f32 %v555_v15, %v580_v38  ;;  %v1617_v38 = vld [vmem:[%s2760_s11] ss:$0 sm:$0xff] }
 0x39d   :  { %v2391_v40 = vsub.f32 %v553_v17, %v578_v39  ;;  %v568_v41 = vpop.xlane.xlu1 %567 }
 0x39e   :  { %v564_v42 = vpop.xlane.xlu0 %563  ;;  %v581_v43 = vmul.f32 0.0078125, %v568_v41  ;;  %v596_v47 = vmul.f32 %v2393_v32, %v2393_v32 }
 0x39f   :  { %v579_v44 = vmul.f32 0.0078125, %v564_v42  ;;  %v594_v37 = vmul.f32 %v2391_v40, %v2391_v40 }
 0x3a0   :  { %v2399_v45 = vsub.f32 %v556_v18, %v581_v43 }
 0x3a1   :  { %v2397_v34 = vsub.f32 %v554_v20, %v579_v44  ;;  %602 = vadd.xlane.f32.xlu0 %v594_v37 }
 0x3a2   :  { %v570_v35 = vpop.xlane.xlu0 %569  ;;  %v597_v55 = vmul.f32 %v2399_v45, %v2399_v45 }
 0x3a3   :  { %v582_v46 = vmul.f32 0.0078125, %v570_v35  ;;  %v595_v48 = vmul.f32 %v2397_v34, %v2397_v34 }
 0x3a4   :  { %v572_v49 = vpop.xlane.xlu1 %571 }
 0x3a5   :  { %v2405_v50 = vsub.f32 %v557_v27, %v582_v46  ;;  %v583_v51 = vmul.f32 0.0078125, %v572_v49  ;;  %606 = vadd.xlane.f32.xlu0 %v596_v47  ;;  %604 = vadd.xlane.f32.xlu1 %v595_v48  ;;  %v1618_v47 = vld [vmem:[%s2723_s8] ss:$0 sm:$0xff] }
 0x3a6   :  { %v574_v52 = vpop.xlane.xlu0 %573 }
 0x3a7   :  { %v2407_v53 = vsub.f32 %v558_v25, %v583_v51  ;;  %v584_v54 = vmul.f32 0.0078125, %v574_v52  ;;  %v598_v56 = vmul.f32 %v2405_v50, %v2405_v50 }
 0x3a8   :  { %v576_v57 = vpop.xlane.xlu1 %575 }
 0x3a9   :  { %v2413_v58 = vsub.f32 %v559_v23, %v584_v54  ;;  %v585_v59 = vmul.f32 0.0078125, %v576_v57  ;;  %608 = vadd.xlane.f32.xlu1 %v597_v55  ;;  %610 = vadd.xlane.f32.xlu0 %v598_v56  ;;  %v599_v61 = vmul.f32 %v2407_v53, %v2407_v53 }
 0x3ab   :  { %v2415_v60 = vsub.f32 %v560_v26, %v585_v59  ;;  %v600_v62 = vmul.f32 %v2413_v58, %v2413_v58 }
 0x3ad   :  { %612 = vadd.xlane.f32.xlu1 %v599_v61  ;;  %614 = vadd.xlane.f32.xlu0 %v600_v62  ;;  %v601_v0 = vmul.f32 %v2415_v60, %v2415_v60 }
 0x3b1   :  { %616 = vadd.xlane.f32.xlu1 %v601_v0 }
 0x42e   :  { %v603_v14 = vpop.xlane.xlu0 %602 }
 0x42f   :  { %v618_v15 = vmul.f32 0.0078125, %v603_v14 }
 0x431   :  { %v626_v16 = vadd.f32 1e-05, %v618_v15 }
 0x432   :  { %v605_v17 = vpop.xlane.xlu1 %604  ;;  %v607_v18 = vpop.xlane.xlu0 %606 }
 0x433   :  { %1951 = vrsqrt.f32 %v626_v16  ;;  %v619_v19 = vmul.f32 0.0078125, %v605_v17  ;;  %v620_v20 = vmul.f32 0.0078125, %v607_v18 }
 0x435   :  { %v627_v21 = vadd.f32 1e-05, %v619_v19  ;;  %v628_v22 = vadd.f32 1e-05, %v620_v20  ;;  %v1933_v20 = vld [vmem:[#allocation7 + $0x30] sm:$0xff]  }
 0x436   :  { %v609_v24 = vpop.xlane.xlu1 %608  ;;  %v611_v28 = vpop.xlane.xlu0 %610  ;;  %1831 = vmatprep.subr.bf16.mxu0 %v1933_v20 }
 0x437   :  { %1953 = vrsqrt.f32 %v627_v21  ;;  %v621_v29 = vmul.f32 0.0078125, %v609_v24  ;;  %v622_v30 = vmul.f32 0.0078125, %v611_v28  ;;  %1832 = vmatpush3.bf16.msra.mxu0 %v1933_v20  ;;  %v1934_v21 = vld [vmem:[#allocation7 + $0x38] sm:$0xff]  }
 0x438   :  { %1955 = vrsqrt.f32 %v628_v22  ;;  %1833 = vmatprep.subr.bf16.mxu0 %v1934_v21  ;;  %v1619_v22 = vld [vmem:[%s2725_s10] ss:$0 sm:$0xff] }
 0x439   :  { %v629_v27 = vadd.f32 1e-05, %v621_v29  ;;  %v630_v31 = vadd.f32 1e-05, %v622_v30 }
 0x43a   :  { %v613_v25 = vpop.xlane.xlu1 %612  ;;  %v615_v23 = vpop.xlane.xlu0 %614 }
 0x43b   :  { %1957 = vrsqrt.f32 %v629_v27  ;;  %v623_v26 = vmul.f32 0.0078125, %v613_v25  ;;  %v624_v33 = vmul.f32 0.0078125, %v615_v23  ;;  %1834 = vmatpush3.bf16.msra.mxu0 %v1934_v21 }
 0x43c   :  { %1959 = vrsqrt.f32 %v630_v31 }
 0x43d   :  { %v1952_v36 = vpop.eup %1951  ;;  %v631_v39 = vadd.f32 1e-05, %v623_v26  ;;  %v632_v41 = vadd.f32 1e-05, %v624_v33 }
 0x43e   :  { %v617_v42 = vpop.xlane.xlu1 %616  ;;  %v642_v43 = vmul.f32 %v1952_v36, %v2391_v40 }
 0x43f   :  { %1961 = vrsqrt.f32 %v631_v39  ;;  %v625_v44 = vmul.f32 0.0078125, %v617_v42 }
 0x440   :  { %1963 = vrsqrt.f32 %v632_v41  ;;  %v657_v37 = vmul.f32 %v1617_v38, %v642_v43 }
 0x441   :  { %v1954_v35 = vpop.eup %1953  ;;  %v633_v46 = vadd.f32 1e-05, %v625_v44 }
 0x442   :  { %v1956_v48 = vpop.eup %1955  ;;  %v643_v49 = vmul.f32 %v1954_v35, %v2397_v34  ;;  %v2456_v54 = vadd.f32 %v1618_v47, %v657_v37 }
 0x443   :  { %v644_v51 = vmul.f32 %v1956_v48, %v2393_v32  ;;  %1965 = vrsqrt.f32 %v633_v46 }
 0x444   :  { %v658_v52 = vmul.f32 %v1617_v38, %v643_v49  ;;  %v680_v63 = vmax.f32 %v2456_v54, 0.0 }
 0x445   :  { %v1958_v40 = vpop.eup %1957  ;;  %v659_v55 = vmul.f32 %v1617_v38, %v644_v51 }
 0x446   :  { %v1960_v56 = vpop.eup %1959  ;;  %v645_v57 = vmul.f32 %v1958_v40, %v2399_v45  ;;  %v2459_v59 = vadd.f32 %v1618_v47, %v658_v52 }
 0x447   :  { %v646_v61 = vmul.f32 %v1960_v56, %v2405_v50  ;;  %v2464_v0 = vadd.f32 %v1618_v47, %v659_v55 }
 0x448   :  { %v660_v62 = vmul.f32 %v1617_v38, %v645_v57  ;;  %v681_v34 = vmax.f32 %v2459_v59, 0.0  ;;  %v1628_v57 = vld [vmem:[%s2727_s12] ss:$0 sm:$0xff] }
 0x449   :  { %v1962_v32 = vpop.eup %1961  ;;  %v661_v1 = vmul.f32 %v1617_v38, %v646_v61  ;;  %v682_v5 = vmax.f32 %v2464_v0, 0.0 }
 0x44a   :  { %v1964_v2 = vpop.eup %1963  ;;  %v688_v3 = vpack.c.bf16 %v681_v34, %v680_v63  ;;  %v2470_v45 = vadd.f32 %v1618_v47, %v660_v62  ;;  %v647_v4 = vmul.f32 %v1962_v32, %v2407_v53 }
 0x44b   :  { %v648_v50 = vmul.f32 %v1964_v2, %v2413_v58  ;;  %v2476_v8 = vadd.f32 %v1618_v47, %v661_v1 }
 0x44c   :  { %1811 = vmatprep.mubr.bf16.mxu1 %v688_v3  ;;  %v683_v6 = vmax.f32 %v2470_v45, 0.0  ;;  %v662_v7 = vmul.f32 %v1617_v38, %v647_v4 }
 0x44d   :  { %v1966_v9 = vpop.eup %1965  ;;  %v663_v10 = vmul.f32 %v1617_v38, %v648_v50  ;;  %v684_v58 = vmax.f32 %v2476_v8, 0.0 }
 0x44e   :  { %v689_v11 = vpack.c.bf16 %v683_v6, %v682_v5  ;;  %v2482_v12 = vadd.f32 %v1618_v47, %v662_v7  ;;  %v649_v53 = vmul.f32 %v1966_v9, %v2415_v60 }
 0x44f   :  { %v2487_v15 = vadd.f32 %v1618_v47, %v663_v10 }
 0x450   :  { %1812 = vmatmul.mubr.bf16.vlgmr.msra.gmra.mrb[8].mxu1 %v689_v11  ;;  %v685_v13 = vmax.f32 %v2482_v12, 0.0  ;;  %v664_v14 = vmul.f32 %v1617_v38, %v649_v53 }
 0x451   :  { %v686_v18 = vmax.f32 %v2487_v15, 0.0 }
 0x452   :  { %v690_v16 = vpack.c.bf16 %v685_v13, %v684_v58  ;;  %v2493_v17 = vadd.f32 %v1618_v47, %v664_v14 }
 0x454   :  { %1815 = vmatprep.mubr.bf16.mxu1 %v690_v16  ;;  %v687_v60 = vmax.f32 %v2493_v17, 0.0 }
 0x456   :  { %v691_v19 = vpack.c.bf16 %v687_v60, %v686_v18 }
 0x458   :  { %1816 = vmatmul.mubr.bf16.gmra.mrb[12].mxu1 %v691_v19 }
 0x523   :  { %v1813_v24 = vpop.f32.mrb[8].mxu1 }
 0x524   :  { %v806_v28 = vadd.f32 %v1813_v24, %v1619_v22  ;;  %v797_v29 = vpop.f32.mrb[9].mxu1 }
 0x525   :  { %v798_v30 = vadd.f32 %v1619_v22, %v797_v29  ;;  %v1814_v27 = vpop.f32.mrb[10].mxu1 }
 0x526   :  { %v809_v31 = vadd.f32 %v1814_v27, %v1619_v22  ;;  %v800_v25 = vpop.f32.mrb[11].mxu1  ;;  %v830_v26 = vmax.f32 %v806_v28, 0.0 }
 0x527   :  { %v801_v23 = vadd.f32 %v1619_v22, %v800_v25  ;;  %v828_v36 = vmax.f32 %v798_v30, 0.0 }
 0x528   :  { %v831_v33 = vmax.f32 %v809_v31, 0.0 }
 0x529   :  { %v829_v38 = vmax.f32 %v801_v23, 0.0 }
 0x52a   :  { %v837_v39 = vpack.c.bf16 %v831_v33, %v830_v26 }
 0x52b   :  { %v836_v41 = vpack.c.bf16 %v829_v38, %v828_v36  ;;  %v1817_v42 = vpop.f32.mrb[12].mxu1 }
 0x52c   :  { %v822_v43 = vadd.f32 %v1817_v42, %v1619_v22  ;;  %v813_v44 = vpop.f32.mrb[13].mxu1 }
 0x52d   :  { %v814_v37 = vadd.f32 %v1619_v22, %v813_v44  ;;  %v1818_v35 = vpop.f32.mrb[14].mxu1  ;;  %1835 = vmatprep.mubr.bf16.mxu0 %v836_v41 }
 0x52e   :  { %v825_v46 = vadd.f32 %v1818_v35, %v1619_v22  ;;  %v816_v47 = vpop.f32.mrb[15].mxu1  ;;  %1836 = vmatmul.mubr.bf16.vlgmr.msra.gmra.mrb[16].mxu0 %v837_v39  ;;  %v834_v49 = vmax.f32 %v822_v43, 0.0 }
 0x52f   :  { %v817_v48 = vadd.f32 %v1619_v22, %v816_v47  ;;  %v832_v52 = vmax.f32 %v814_v37, 0.0 }
 0x530   :  { %v835_v51 = vmax.f32 %v825_v46, 0.0 }
 0x531   :  { %v833_v40 = vmax.f32 %v817_v48, 0.0 }
 0x532   :  { %v839_v55 = vpack.c.bf16 %v835_v51, %v834_v49  ;;  %v1936_v49 = vld [vmem:[#allocation8 + $0x8] sm:$0xff]   ;;  %v1937_v51 = vld [vmem:[#allocation8 + $0x10] sm:$0xff]  }
 0x533   :  { %v838_v56 = vpack.c.bf16 %v833_v40, %v832_v52  ;;  %v1938_v52 = vld [vmem:[#allocation8 + $0x18] sm:$0xff]   ;;  %v1939_v40 = vld [vmem:[#allocation8 + $0x20] sm:$0xff]  }
 0x535   :  { %1839 = vmatprep.mubr.bf16.mxu0 %v838_v56  ;;  %v1941_v56 = vld [vmem:[#allocation8 + $0x30] sm:$0xff]  }
 0x536   :  { %1840 = vmatmul.mubr.bf16.gmra.mrb[20].mxu0 %v839_v55  ;;  %v1940_v55 = vld [vmem:[#allocation8 + $0x28] sm:$0xff]  }
 0x601   :  { %v1837_v61 = vpop.f32.mrb[16].mxu0 }
 0x602   :  { %v945_v62 = vpop.f32.mrb[17].mxu0  ;;  %v954_v3 = vadd.f32 %v1837_v61, %v1628_v57  ;;  %v1943_v61 = vld [vmem:[#allocation10] sm:$0xff]  }
 0x603   :  { %v946_v32 = vadd.f32 %v1628_v57, %v945_v62  ;;  %v1838_v1 = vpop.f32.mrb[18].mxu0  ;;  %v1944_v62 = vld [vmem:[#allocation10 + $0x8] sm:$0xff]   ;;  %1867 = vmatprep.subr.bf16.mxu0 %v1943_v61 }
 0x604   :  { %v948_v2 = vpop.f32.mrb[19].mxu0  ;;  %v957_v7 = vadd.f32 %v1838_v1, %v1628_v57  ;;  %v978_v11 = vadd.f32 %v954_v3, %v682_v5  ;;  %1868 = vmatpush3.bf16.msra.mxu0 %v1943_v61  ;;  %v1946_v1 = vld [vmem:[#allocation10 + $0x18] sm:$0xff]   ;;  %v1948_v3 = vld [vmem:[#allocation10 + $0x28] sm:$0xff]  }
 0x605   :  { %v949_v4 = vadd.f32 %v1628_v57, %v948_v2  ;;  %v976_v50 = vadd.f32 %v946_v32, %v680_v63  ;;  %1869 = vmatprep.subr.bf16.mxu0 %v1944_v62  ;;  %v1945_v32 = vld [vmem:[#allocation10 + $0x10] sm:$0xff]   ;;  %v1947_v2 = vld [vmem:[#allocation10 + $0x20] sm:$0xff]  }
 0x606   :  { %v979_v19 = vadd.f32 %v957_v7, %v683_v6  ;;  %v1935_v6 = vld [vmem:[#allocation8] sm:$0xff]  }
 0x607   :  { %984 = vadd.xlane.f32.xlu0 %v976_v50  ;;  %v977_v9 = vadd.f32 %v949_v4, %v681_v34  ;;  %1843 = vmatprep.subr.bf16.mxu1 %v1935_v6 }
 0x608   :  { %1844 = vmatpush3.bf16.msra.mxu1 %v1935_v6  ;;  %1870 = vmatpush3.bf16.msra.mxu0 %v1944_v62 }
 0x609   :  { %986 = vadd.xlane.f32.xlu1 %v977_v9  ;;  %v1841_v10 = vpop.f32.mrb[20].mxu0  ;;  %1845 = vmatprep.subr.bf16.mxu1 %v1936_v49 }
 0x60a   :  { %v961_v53 = vpop.f32.mrb[21].mxu0  ;;  %v970_v54 = vadd.f32 %v1841_v10, %v1628_v57  ;;  %1871 = vmatprep.subr.bf16.mxu0 %v1945_v32 }
 0x60b   :  { %v962_v14 = vadd.f32 %v1628_v57, %v961_v53  ;;  %988 = vadd.xlane.f32.xlu0 %v978_v11  ;;  %v1842_v16 = vpop.f32.mrb[22].mxu0 }
 0x60c   :  { %v964_v20 = vpop.f32.mrb[23].mxu0  ;;  %v973_v34 = vadd.f32 %v1842_v16, %v1628_v57  ;;  %v982_v5 = vadd.f32 %v970_v54, %v686_v18  ;;  %1846 = vmatpush3.bf16.msra.mxu1 %v1936_v49  ;;  %1872 = vmatpush3.bf16.msra.mxu0 %v1945_v32 }
 0x60d   :  { %v965_v63 = vadd.f32 %v1628_v57, %v964_v20  ;;  %990 = vadd.xlane.f32.xlu1 %v979_v19  ;;  %v980_v59 = vadd.f32 %v962_v14, %v684_v58  ;;  %1847 = vmatprep.subr.bf16.mxu1 %v1937_v51  ;;  %v1942_v57 = vld [vmem:[#allocation8 + $0x38] sm:$0xff]  }
 0x60e   :  { %v983_v45 = vadd.f32 %v973_v34, %v687_v60  ;;  %1873 = vmatprep.subr.bf16.mxu0 %v1946_v1 }
 0x60f   :  { %992 = vadd.xlane.f32.xlu0 %v980_v59  ;;  %v981_v0 = vadd.f32 %v965_v63, %v685_v13 }
 0x610   :  { %1848 = vmatpush3.bf16.msra.mxu1 %v1937_v51  ;;  %1874 = vmatpush3.bf16.msra.mxu0 %v1946_v1 }
 0x611   :  { %994 = vadd.xlane.f32.xlu1 %v981_v0  ;;  %1849 = vmatprep.subr.bf16.mxu1 %v1938_v52 }
 0x612   :  { %1875 = vmatprep.subr.bf16.mxu0 %v1947_v2 }
 0x613   :  { %996 = vadd.xlane.f32.xlu0 %v982_v5 }
 0x614   :  { %1850 = vmatpush3.bf16.msra.mxu1 %v1938_v52  ;;  %1876 = vmatpush3.bf16.msra.mxu0 %v1947_v2 }
 0x615   :  { %998 = vadd.xlane.f32.xlu1 %v983_v45  ;;  %1851 = vmatprep.subr.bf16.mxu1 %v1939_v40 }
 0x616   :  { %1877 = vmatprep.subr.bf16.mxu0 %v1948_v3 }
 0x618   :  { %1852 = vmatpush3.bf16.msra.mxu1 %v1939_v40  ;;  %1878 = vmatpush3.bf16.msra.mxu0 %v1948_v3 }
 0x619   :  { %1853 = vmatprep.subr.bf16.mxu1 %v1940_v55 }
 0x61c   :  { %1854 = vmatpush3.bf16.msra.mxu1 %v1940_v55 }
 0x61d   :  { %1855 = vmatprep.subr.bf16.mxu1 %v1941_v56 }
 0x620   :  { %1856 = vmatpush3.bf16.msra.mxu1 %v1941_v56 }
 0x621   :  { %1857 = vmatprep.subr.bf16.mxu1 %v1942_v57 }
 0x624   :  { %1858 = vmatpush3.bf16.msra.mxu1 %v1942_v57 }
 0x694   :  { %v985_v21 = vpop.xlane.xlu0 %984 }
 0x695   :  { %v1000_v8 = vmul.f32 0.0078125, %v985_v21 }
 0x696   :  { %v987_v58 = vpop.xlane.xlu1 %986 }
 0x697   :  { %v2523_v22 = vsub.f32 %v976_v50, %v1000_v8  ;;  %v1001_v24 = vmul.f32 0.0078125, %v987_v58 }
 0x698   :  { %v989_v12 = vpop.xlane.xlu0 %988 }
 0x699   :  { %v2525_v13 = vsub.f32 %v977_v9, %v1001_v24  ;;  %v1002_v28 = vmul.f32 0.0078125, %v989_v12  ;;  %v1016_v15 = vmul.f32 %v2523_v22, %v2523_v22  ;;  %v1637_v24 = vld [vmem:[%s2728_s13] ss:$0 sm:$0xff] }
 0x69a   :  { %v991_v18 = vpop.xlane.xlu1 %990 }
 0x69b   :  { %v2529_v17 = vsub.f32 %v978_v11, %v1002_v28  ;;  %v1003_v60 = vmul.f32 0.0078125, %v991_v18  ;;  %1024 = vadd.xlane.f32.xlu0 %v1016_v15  ;;  %v1017_v29 = vmul.f32 %v2525_v13, %v2525_v13 }
 0x69c   :  { %v993_v30 = vpop.xlane.xlu0 %992 }
 0x69d   :  { %v2533_v27 = vsub.f32 %v979_v19, %v1003_v60  ;;  %v1004_v31 = vmul.f32 0.0078125, %v993_v30  ;;  %1026 = vadd.xlane.f32.xlu1 %v1017_v29  ;;  %v1018_v25 = vmul.f32 %v2529_v17, %v2529_v17  ;;  %v1638_v29 = vld [vmem:[%s2729_s14] ss:$0 sm:$0xff] }
 0x69e   :  { %v995_v23 = vpop.xlane.xlu1 %994 }
 0x69f   :  { %v2537_v26 = vsub.f32 %v980_v59, %v1004_v31  ;;  %v1005_v33 = vmul.f32 0.0078125, %v995_v23  ;;  %1028 = vadd.xlane.f32.xlu0 %v1018_v25  ;;  %v1019_v36 = vmul.f32 %v2533_v27, %v2533_v27 }
 0x6a0   :  { %v997_v38 = vpop.xlane.xlu0 %996 }
 0x6a1   :  { %v2541_v39 = vsub.f32 %v981_v0, %v1005_v33  ;;  %v1006_v41 = vmul.f32 0.0078125, %v997_v38  ;;  %1030 = vadd.xlane.f32.xlu1 %v1019_v36  ;;  %v1020_v42 = vmul.f32 %v2537_v26, %v2537_v26 }
 0x6a2   :  { %v999_v43 = vpop.xlane.xlu1 %998 }
 0x6a3   :  { %v2545_v44 = vsub.f32 %v982_v5, %v1006_v41  ;;  %v1007_v37 = vmul.f32 0.0078125, %v999_v43  ;;  %1032 = vadd.xlane.f32.xlu0 %v1020_v42  ;;  %v1021_v35 = vmul.f32 %v2541_v39, %v2541_v39 }
 0x6a5   :  { %v2549_v46 = vsub.f32 %v983_v45, %v1007_v37  ;;  %1034 = vadd.xlane.f32.xlu1 %v1021_v35  ;;  %v1022_v47 = vmul.f32 %v2545_v44, %v2545_v44 }
 0x6a7   :  { %1036 = vadd.xlane.f32.xlu0 %v1022_v47  ;;  %v1023_v48 = vmul.f32 %v2549_v46, %v2549_v46 }
 0x6a9   :  { %1038 = vadd.xlane.f32.xlu1 %v1023_v48 }
 0x728   :  { %v1025_v4 = vpop.xlane.xlu0 %1024 }
 0x729   :  { %v1040_v50 = vmul.f32 0.0078125, %v1025_v4 }
 0x72a   :  { %v1027_v7 = vpop.xlane.xlu1 %1026 }
 0x72b   :  { %v1048_v9 = vadd.f32 1e-05, %v1040_v50  ;;  %v1041_v10 = vmul.f32 0.0078125, %v1027_v7 }
 0x72c   :  { %v1029_v11 = vpop.xlane.xlu0 %1028 }
 0x72d   :  { %1967 = vrsqrt.f32 %v1048_v9  ;;  %v1049_v53 = vadd.f32 1e-05, %v1041_v10  ;;  %v1042_v14 = vmul.f32 0.0078125, %v1029_v11 }
 0x72e   :  { %v1031_v16 = vpop.xlane.xlu1 %1030 }
 0x72f   :  { %1969 = vrsqrt.f32 %v1049_v53  ;;  %v1050_v19 = vadd.f32 1e-05, %v1042_v14  ;;  %v1043_v20 = vmul.f32 0.0078125, %v1031_v16  ;;  %v1949_v53 = vld [vmem:[#allocation10 + $0x30] sm:$0xff]   ;;  %v1950_v14 = vld [vmem:[#allocation10 + $0x38] sm:$0xff]  }
 0x730   :  { %v1033_v54 = vpop.xlane.xlu0 %1032  ;;  %1879 = vmatprep.subr.bf16.mxu0 %v1949_v53  ;;  %v1639_v16 = vld [vmem:[%s2731_s16] ss:$0 sm:$0xff] }
 0x731   :  { %1971 = vrsqrt.f32 %v1050_v19  ;;  %v1051_v63 = vadd.f32 1e-05, %v1043_v20  ;;  %v1044_v59 = vmul.f32 0.0078125, %v1033_v54  ;;  %1880 = vmatpush3.bf16.msra.mxu0 %v1949_v53 }
 0x732   :  { %v1035_v34 = vpop.xlane.xlu1 %1034  ;;  %1881 = vmatprep.subr.bf16.mxu0 %v1950_v14 }
 0x733   :  { %1973 = vrsqrt.f32 %v1051_v63  ;;  %v1052_v0 = vadd.f32 1e-05, %v1044_v59  ;;  %v1045_v5 = vmul.f32 0.0078125, %v1035_v34 }
 0x734   :  { %v1037_v45 = vpop.xlane.xlu0 %1036 }
 0x735   :  { %1975 = vrsqrt.f32 %v1052_v0  ;;  %v1053_v6 = vadd.f32 1e-05, %v1045_v5  ;;  %v1046_v21 = vmul.f32 0.0078125, %v1037_v45  ;;  %1882 = vmatpush3.bf16.msra.mxu0 %v1950_v14 }
 0x736   :  { %v1039_v8 = vpop.xlane.xlu1 %1038 }
 0x737   :  { %v1968_v58 = vpop.eup %1967  ;;  %1977 = vrsqrt.f32 %v1053_v6  ;;  %v1054_v12 = vadd.f32 1e-05, %v1046_v21  ;;  %v1047_v28 = vmul.f32 0.0078125, %v1039_v8 }
 0x738   :  { %v1064_v15 = vmul.f32 %v1968_v58, %v2523_v22 }
 0x739   :  { %v1970_v18 = vpop.eup %1969  ;;  %1979 = vrsqrt.f32 %v1054_v12  ;;  %v1055_v60 = vadd.f32 1e-05, %v1047_v28 }
 0x73a   :  { %v1065_v30 = vmul.f32 %v1970_v18, %v2525_v13  ;;  %v1079_v31 = vmul.f32 %v1637_v24, %v1064_v15 }
 0x73b   :  { %v1972_v25 = vpop.eup %1971  ;;  %1981 = vrsqrt.f32 %v1055_v60 }
 0x73c   :  { %v1066_v23 = vmul.f32 %v1972_v25, %v2529_v17  ;;  %v1080_v33 = vmul.f32 %v1637_v24, %v1065_v30  ;;  %v2564_v36 = vadd.f32 %v1638_v29, %v1079_v31 }
 0x73d   :  { %v1974_v38 = vpop.eup %1973 }
 0x73e   :  { %v1081_v41 = vmul.f32 %v1637_v24, %v1066_v23  ;;  %v1067_v22 = vmul.f32 %v1974_v38, %v2533_v27  ;;  %v2567_v42 = vadd.f32 %v1638_v29, %v1080_v33  ;;  %v1102_v37 = vmax.f32 %v2564_v36, 0.0 }
 0x73f   :  { %v1976_v43 = vpop.eup %1975 }
 0x740   :  { %v1082_v35 = vmul.f32 %v1637_v24, %v1067_v22  ;;  %v1103_v13 = vmax.f32 %v2567_v42, 0.0  ;;  %v2571_v47 = vadd.f32 %v1638_v29, %v1081_v41  ;;  %v1068_v48 = vmul.f32 %v1976_v43, %v2537_v26  ;;  %v1648_v43 = vld [vmem:[%s2733_s18] ss:$0 sm:$0xff] }
 0x741   :  { %v1978_v17 = vpop.eup %1977 }
 0x742   :  { %v1110_v49 = vpack.c.bf16 %v1103_v13, %v1102_v37  ;;  %v2578_v51 = vadd.f32 %v1638_v29, %v1082_v35  ;;  %v1069_v27 = vmul.f32 %v1978_v17, %v2541_v39  ;;  %v1083_v40 = vmul.f32 %v1637_v24, %v1068_v48 }
 0x743   :  { %v1980_v52 = vpop.eup %1979  ;;  %v1104_v55 = vmax.f32 %v2571_v47, 0.0 }
 0x744   :  { %1859 = vmatprep.mubr.bf16.mxu1 %v1110_v49  ;;  %v1105_v56 = vmax.f32 %v2578_v51, 0.0  ;;  %v1084_v57 = vmul.f32 %v1637_v24, %v1069_v27  ;;  %v1070_v26 = vmul.f32 %v1980_v52, %v2545_v44  ;;  %v2584_v62 = vadd.f32 %v1638_v29, %v1083_v40 }
 0x745   :  { %v1982_v61 = vpop.eup %1981 }
 0x746   :  { %v1111_v32 = vpack.c.bf16 %v1105_v56, %v1104_v55  ;;  %v2590_v1 = vadd.f32 %v1638_v29, %v1084_v57  ;;  %v1071_v39 = vmul.f32 %v1982_v61, %v2549_v46  ;;  %v1085_v2 = vmul.f32 %v1637_v24, %v1070_v26 }
 0x747   :  { %v1106_v3 = vmax.f32 %v2584_v62, 0.0 }
 0x748   :  { %1860 = vmatmul.mubr.bf16.vlgmr.msra.gmra.mrb[16].mxu1 %v1111_v32  ;;  %v1107_v4 = vmax.f32 %v2590_v1, 0.0  ;;  %v1086_v50 = vmul.f32 %v1637_v24, %v1071_v39  ;;  %v2595_v44 = vadd.f32 %v1638_v29, %v1085_v2 }
 0x74a   :  { %v1112_v7 = vpack.c.bf16 %v1107_v4, %v1106_v3  ;;  %v2601_v9 = vadd.f32 %v1638_v29, %v1086_v50  ;;  %v1108_v10 = vmax.f32 %v2595_v44, 0.0 }
 0x74c   :  { %1863 = vmatprep.mubr.bf16.mxu1 %v1112_v7  ;;  %v1109_v46 = vmax.f32 %v2601_v9, 0.0 }
 0x74e   :  { %v1113_v11 = vpack.c.bf16 %v1109_v46, %v1108_v10 }
 0x750   :  { %1864 = vmatmul.mubr.bf16.gmra.mrb[20].mxu1 %v1113_v11 }
 0x81b   :  { %v1861_v19 = vpop.f32.mrb[16].mxu1 }
 0x81c   :  { %v1228_v20 = vadd.f32 %v1861_v19, %v1639_v16  ;;  %v1219_v54 = vpop.f32.mrb[17].mxu1 }
 0x81d   :  { %v1220_v63 = vadd.f32 %v1639_v16, %v1219_v54  ;;  %v1862_v59 = vpop.f32.mrb[18].mxu1 }
 0x81e   :  { %v1231_v34 = vadd.f32 %v1862_v59, %v1639_v16  ;;  %v1222_v0 = vpop.f32.mrb[19].mxu1  ;;  %v1252_v45 = vmax.f32 %v1228_v20, 0.0 }
 0x81f   :  { %v1223_v5 = vadd.f32 %v1639_v16, %v1222_v0  ;;  %v1250_v21 = vmax.f32 %v1220_v63, 0.0 }
 0x820   :  { %v1253_v6 = vmax.f32 %v1231_v34, 0.0 }
 0x821   :  { %v1251_v8 = vmax.f32 %v1223_v5, 0.0 }
 0x822   :  { %v1259_v58 = vpack.c.bf16 %v1253_v6, %v1252_v45 }
 0x823   :  { %v1258_v24 = vpack.c.bf16 %v1251_v8, %v1250_v21  ;;  %v1865_v12 = vpop.f32.mrb[20].mxu1 }
 0x824   :  { %v1244_v28 = vadd.f32 %v1865_v12, %v1639_v16  ;;  %v1235_v15 = vpop.f32.mrb[21].mxu1 }
 0x825   :  { %v1236_v18 = vadd.f32 %v1639_v16, %v1235_v15  ;;  %v1866_v60 = vpop.f32.mrb[22].mxu1  ;;  %1883 = vmatprep.mubr.bf16.mxu0 %v1258_v24 }
 0x826   :  { %v1247_v29 = vadd.f32 %v1866_v60, %v1639_v16  ;;  %v1238_v30 = vpop.f32.mrb[23].mxu1  ;;  %1884 = vmatmul.mubr.bf16.vlgmr.msra.gmra.mrb[24].mxu0 %v1259_v58  ;;  %v1256_v25 = vmax.f32 %v1244_v28, 0.0 }
 0x827   :  { %v1239_v31 = vadd.f32 %v1639_v16, %v1238_v30  ;;  %v1254_v33 = vmax.f32 %v1236_v18, 0.0 }
 0x828   :  { %v1257_v23 = vmax.f32 %v1247_v29, 0.0 }
 0x829   :  { %v1255_v38 = vmax.f32 %v1239_v31, 0.0 }
 0x82a   :  { %v1261_v41 = vpack.c.bf16 %v1257_v23, %v1256_v25 }
 0x82b   :  { %v1260_v22 = vpack.c.bf16 %v1255_v38, %v1254_v33 }
 0x82d   :  { %1887 = vmatprep.mubr.bf16.mxu0 %v1260_v22 }
 0x82e   :  { %1888 = vmatmul.mubr.bf16.gmra.mrb[28].mxu0 %v1261_v41 }
 0x8f9   :  { %v1885_v35 = vpop.f32.mrb[24].mxu0 }
 0x8fa   :  { %v1376_v48 = vadd.f32 %v1885_v35, %v1648_v43  ;;  %v1367_v17 = vpop.f32.mrb[25].mxu0 }
 0x8fb   :  { %v1886_v49 = vpop.f32.mrb[26].mxu0  ;;  %v1368_v27 = vadd.f32 %v1648_v43, %v1367_v17 }
 0x8fc   :  { %v1379_v52 = vadd.f32 %v1886_v49, %v1648_v43  ;;  %v1370_v40 = vpop.f32.mrb[27].mxu0  ;;  %v1400_v57 = vadd.f32 %v1376_v48, %v1104_v55 }
 0x8fd   :  { %v1371_v26 = vadd.f32 %v1648_v43, %v1370_v40  ;;  %v1398_v32 = vadd.f32 %v1368_v27, %v1102_v37 }
 0x8fe   :  { %1410 = vadd.xlane.f32.xlu0 %v1400_v57  ;;  %v1401_v61 = vadd.f32 %v1379_v52, %v1105_v56 }
 0x8ff   :  { %v1399_v50 = vadd.f32 %v1371_v26, %v1103_v13 }
 0x900   :  { %1412 = vadd.xlane.f32.xlu1 %v1401_v61 }
 0x901   :  { %v1889_v39 = vpop.f32.mrb[28].mxu0 }
 0x902   :  { %1406 = vadd.xlane.f32.xlu0 %v1398_v32  ;;  %v1383_v2 = vpop.f32.mrb[29].mxu0  ;;  %v1392_v55 = vadd.f32 %v1889_v39, %v1648_v43 }
 0x903   :  { %v1384_v7 = vadd.f32 %v1648_v43, %v1383_v2  ;;  %v1890_v11 = vpop.f32.mrb[30].mxu0 }
 0x904   :  { %1408 = vadd.xlane.f32.xlu1 %v1399_v50  ;;  %v1386_v47 = vpop.f32.mrb[31].mxu0  ;;  %v1395_v56 = vadd.f32 %v1890_v11, %v1648_v43  ;;  %v1404_v37 = vadd.f32 %v1392_v55, %v1108_v10 }
 0x905   :  { %v1387_v53 = vadd.f32 %v1648_v43, %v1386_v47  ;;  %v1402_v51 = vadd.f32 %v1384_v7, %v1106_v3  ;;  %v1657_v7 = vld [vmem:[%s2734_s19] ss:$0 sm:$0xff] }
 0x906   :  { %v1405_v42 = vadd.f32 %v1395_v56, %v1109_v46 }
 0x907   :  { %1414 = vadd.xlane.f32.xlu0 %v1402_v51  ;;  %v1403_v36 = vadd.f32 %v1387_v53, %v1107_v4 }
 0x909   :  { %1416 = vadd.xlane.f32.xlu1 %v1403_v36 }
 0x90b   :  { %1418 = vadd.xlane.f32.xlu0 %v1404_v37 }
 0x90d   :  { %1420 = vadd.xlane.f32.xlu1 %v1405_v42 }
 0x98b   :  { %v1411_v13 = vpop.xlane.xlu0 %1410 }
 0x98c   :  { %v1424_v14 = vmul.f32 0.0078125, %v1411_v13 }
 0x98d   :  { %v1413_v16 = vpop.xlane.xlu1 %1412 }
 0x98e   :  { %v2631_v19 = vsub.f32 %v1400_v57, %v1424_v14  ;;  %v1425_v62 = vmul.f32 0.0078125, %v1413_v16 }
 0x98f   :  { %v1407_v3 = vpop.xlane.xlu0 %1406 }
 0x990   :  { %v2633_v20 = vsub.f32 %v1401_v61, %v1425_v62  ;;  %v1422_v1 = vmul.f32 0.0078125, %v1407_v3  ;;  %v1440_v4 = vmul.f32 %v2631_v19, %v2631_v19 }
 0x991   :  { %v1409_v44 = vpop.xlane.xlu1 %1408 }
 0x992   :  { %v2637_v10 = vsub.f32 %v1398_v32, %v1422_v1  ;;  %v1423_v54 = vmul.f32 0.0078125, %v1409_v44  ;;  %1450 = vadd.xlane.f32.xlu0 %v1440_v4  ;;  %v1441_v9 = vmul.f32 %v2633_v20, %v2633_v20 }
 0x994   :  { %v2641_v46 = vsub.f32 %v1399_v50, %v1423_v54  ;;  %1452 = vadd.xlane.f32.xlu1 %v1441_v9  ;;  %v1415_v63 = vpop.xlane.xlu0 %1414  ;;  %v1438_v59 = vmul.f32 %v2637_v10, %v2637_v10 }
 0x995   :  { %v1426_v34 = vmul.f32 0.0078125, %v1415_v63 }
 0x996   :  { %v1417_v0 = vpop.xlane.xlu1 %1416  ;;  %1446 = vadd.xlane.f32.xlu0 %v1438_v59  ;;  %v1439_v5 = vmul.f32 %v2641_v46, %v2641_v46 }
 0x997   :  { %v2647_v45 = vsub.f32 %v1402_v51, %v1426_v34  ;;  %v1427_v6 = vmul.f32 0.0078125, %v1417_v0  ;;  %v1658_v51 = vld [vmem:[%s2735_s20] ss:$0 sm:$0xff] }
 0x998   :  { %1448 = vadd.xlane.f32.xlu1 %v1439_v5  ;;  %v1419_v21 = vpop.xlane.xlu0 %1418 }
 0x999   :  { %v2649_v8 = vsub.f32 %v1403_v36, %v1427_v6  ;;  %v1428_v58 = vmul.f32 0.0078125, %v1419_v21  ;;  %v1442_v24 = vmul.f32 %v2647_v45, %v2647_v45 }
 0x99a   :  { %v1421_v12 = vpop.xlane.xlu1 %1420 }
 0x99b   :  { %v2653_v28 = vsub.f32 %v1404_v37, %v1428_v58  ;;  %v1429_v15 = vmul.f32 0.0078125, %v1421_v12  ;;  %1454 = vadd.xlane.f32.xlu0 %v1442_v24  ;;  %v1443_v18 = vmul.f32 %v2649_v8, %v2649_v8 }
 0x99d   :  { %v2657_v60 = vsub.f32 %v1405_v42, %v1429_v15  ;;  %1456 = vadd.xlane.f32.xlu1 %v1443_v18  ;;  %v1444_v29 = vmul.f32 %v2653_v28, %v2653_v28 }
 0x99f   :  { %1458 = vadd.xlane.f32.xlu0 %v1444_v29  ;;  %v1445_v30 = vmul.f32 %v2657_v60, %v2657_v60 }
 0x9a1   :  { %1460 = vadd.xlane.f32.xlu1 %v1445_v30 }
 0xa1f   :  { %v1451_v31 = vpop.xlane.xlu0 %1450 }
 0xa20   :  { %v1464_v25 = vmul.f32 0.0078125, %v1451_v31 }
 0xa21   :  { %v1453_v23 = vpop.xlane.xlu1 %1452 }
 0xa22   :  { %v1472_v33 = vadd.f32 1e-05, %v1464_v25  ;;  %v1465_v38 = vmul.f32 0.0078125, %v1453_v23 }
 0xa23   :  { %v1447_v41 = vpop.xlane.xlu0 %1446 }
 0xa24   :  { %1983 = vrsqrt.f32 %v1472_v33  ;;  %v1473_v22 = vadd.f32 1e-05, %v1465_v38  ;;  %v1462_v43 = vmul.f32 0.0078125, %v1447_v41 }
 0xa25   :  { %v1449_v35 = vpop.xlane.xlu1 %1448 }
 0xa26   :  { %1985 = vrsqrt.f32 %v1473_v22  ;;  %v1470_v48 = vadd.f32 1e-05, %v1462_v43  ;;  %v1463_v17 = vmul.f32 0.0078125, %v1449_v35 }
 0xa28   :  { %1987 = vrsqrt.f32 %v1470_v48  ;;  %v1471_v49 = vadd.f32 1e-05, %v1463_v17  ;;  %v1455_v27 = vpop.xlane.xlu0 %1454 }
 0xa29   :  { %v1466_v52 = vmul.f32 0.0078125, %v1455_v27  ;;  %v1564_v27 = vstv %s2761_s29 }
 0xa2a   :  { %1989 = vrsqrt.f32 %v1471_v49  ;;  %v1457_v40 = vpop.xlane.xlu1 %1456 }
 0xa2b   :  { %v1474_v57 = vadd.f32 1e-05, %v1466_v52  ;;  %v1467_v26 = vmul.f32 0.0078125, %v1457_v40 }
 0xa2c   :  { %v1459_v61 = vpop.xlane.xlu0 %1458 }
 0xa2d   :  { %1991 = vrsqrt.f32 %v1474_v57  ;;  %v1475_v32 = vadd.f32 1e-05, %v1467_v26  ;;  %v1468_v39 = vmul.f32 0.0078125, %v1459_v61 }
 0xa2e   :  { %v1984_v2 = vpop.eup %1983  ;;  %v1461_v50 = vpop.xlane.xlu1 %1460 }
 0xa2f   :  { %1993 = vrsqrt.f32 %v1475_v32  ;;  %v1476_v11 = vadd.f32 1e-05, %v1468_v39  ;;  %v1469_v47 = vmul.f32 0.0078125, %v1461_v50  ;;  %v1488_v55 = vmul.f32 %v1984_v2, %v2631_v19  ;;  %v1659_v19 = vld [vmem:[%s2736_s21] ss:$0 sm:$0xff] }
 0xa30   :  { %v1986_v53 = vpop.eup %1985 }
 0xa31   :  { %1995 = vrsqrt.f32 %v1476_v11  ;;  %v1477_v56 = vadd.f32 1e-05, %v1469_v47  ;;  %v1503_v36 = vmul.f32 %v1657_v7, %v1488_v55  ;;  %v1489_v37 = vmul.f32 %v1986_v53, %v2633_v20 }
 0xa32   :  { %v1988_v42 = vpop.eup %1987 }
 0xa33   :  { %1997 = vrsqrt.f32 %v1477_v56  ;;  %v1518_v13 = vadd.f32 %v1658_v51, %v1503_v36  ;;  %v1504_v14 = vmul.f32 %v1657_v7, %v1489_v37  ;;  %v1486_v16 = vmul.f32 %v1988_v42, %v2637_v10 }
 0xa34   :  { %v1990_v62 = vpop.eup %1989 }
 0xa35   :  { %v1526_v3 = vmax.f32 %v1518_v13, 0.0  ;;  %v1519_v1 = vadd.f32 %v1658_v51, %v1504_v14  ;;  %v1501_v4 = vmul.f32 %v1657_v7, %v1486_v16  ;;  %v1487_v44 = vmul.f32 %v1990_v62, %v2641_v46 }
 0xa37   :  { %v1992_v54 = vpop.eup %1991  ;;  %v1541_v9 = vmul.f32 %v1659_v19, %v1526_v3  ;;  %v1527_v63 = vmax.f32 %v1519_v1, 0.0  ;;  %v1516_v20 = vadd.f32 %v1658_v51, %v1501_v4  ;;  %v1502_v59 = vmul.f32 %v1657_v7, %v1487_v44 }
 0xa38   :  { %v1490_v34 = vmul.f32 %v1992_v54, %v2647_v45 }
 0xa39   :  { %v1994_v0 = vpop.eup %1993  ;;  %1551 = vadd.xlane.f32.xlu0 %v1541_v9  ;;  %v1542_v10 = vmul.f32 %v1659_v19, %v1527_v63  ;;  %v1524_v5 = vmax.f32 %v1516_v20, 0.0  ;;  %v1517_v6 = vadd.f32 %v1658_v51, %v1502_v59 }
 0xa3a   :  { %v1505_v21 = vmul.f32 %v1657_v7, %v1490_v34  ;;  %v1491_v58 = vmul.f32 %v1994_v0, %v2649_v8 }
 0xa3b   :  { %v1996_v24 = vpop.eup %1995  ;;  %1553 = vadd.xlane.f32.xlu1 %v1542_v10  ;;  %v1539_v12 = vmul.f32 %v1659_v19, %v1524_v5  ;;  %v1525_v15 = vmax.f32 %v1517_v6, 0.0 }
 0xa3c   :  { %v1520_v46 = vadd.f32 %v1658_v51, %v1505_v21  ;;  %v1506_v18 = vmul.f32 %v1657_v7, %v1491_v58  ;;  %v1492_v29 = vmul.f32 %v1996_v24, %v2653_v28 }
 0xa3d   :  { %v1998_v30 = vpop.eup %1997  ;;  %1547 = vadd.xlane.f32.xlu0 %v1539_v12  ;;  %v1540_v31 = vmul.f32 %v1659_v19, %v1525_v15 }
 0xa3e   :  { %v1528_v45 = vmax.f32 %v1520_v46, 0.0  ;;  %v1521_v25 = vadd.f32 %v1658_v51, %v1506_v18  ;;  %v1507_v23 = vmul.f32 %v1657_v7, %v1492_v29  ;;  %v1493_v33 = vmul.f32 %v1998_v30, %v2657_v60 }
 0xa3f   :  { %1549 = vadd.xlane.f32.xlu1 %v1540_v31 }
 0xa40   :  { %v1543_v38 = vmul.f32 %v1659_v19, %v1528_v45  ;;  %v1529_v41 = vmax.f32 %v1521_v25, 0.0  ;;  %v1522_v8 = vadd.f32 %v1658_v51, %v1507_v23  ;;  %v1508_v22 = vmul.f32 %v1657_v7, %v1493_v33 }
 0xa42   :  { %1555 = vadd.xlane.f32.xlu0 %v1543_v38  ;;  %v1544_v43 = vmul.f32 %v1659_v19, %v1529_v41  ;;  %v1530_v35 = vmax.f32 %v1522_v8, 0.0  ;;  %v1523_v48 = vadd.f32 %v1658_v51, %v1508_v22 }
 0xa44   :  { %1557 = vadd.xlane.f32.xlu1 %v1544_v43  ;;  %v1545_v17 = vmul.f32 %v1659_v19, %v1530_v35  ;;  %v1531_v28 = vmax.f32 %v1523_v48, 0.0 }
 0xa46   :  { %1559 = vadd.xlane.f32.xlu0 %v1545_v17  ;;  %v1546_v49 = vmul.f32 %v1659_v19, %v1531_v28 }
 0xa48   :  { %1561 = vadd.xlane.f32.xlu1 %v1546_v49 }
 0xac6   :  { %v1552_v60 = vpop.xlane.xlu0 %1551 }
 0xac7   :  { %v1567_v52 = vadd.f32 %v1564_v27, %v1552_v60 }
 0xac8   :  { %v1554_v40 = vpop.xlane.xlu1 %1553 }
 0xac9   :  { %1576 = vst.msk [vmem:[%s2762_s4 + $0x10] sm:$0xff] %vm1573_vm1, %v1567_v52  ;;  %v1568_v57 = vadd.f32 %v1564_v27, %v1554_v40 }
 0xaca   :  { %v1548_v26 = vpop.xlane.xlu0 %1547 }
 0xacb   :  { %1577 = vst.msk [vmem:[%s2762_s4 + $0x18] sm:$0xff] %vm1573_vm1, %v1568_v57  ;;  %v1565_v61 = vadd.f32 %v1564_v27, %v1548_v26 }
 0xacc   :  { %v1550_v32 = vpop.xlane.xlu1 %1549 }
 0xacd   :  { %1574 = vst.msk [vmem:[%s2762_s4] sm:$0xff] %vm1573_vm1, %v1565_v61  ;;  %v1566_v39 = vadd.f32 %v1564_v27, %v1550_v32 }
 0xacf   :  { %1575 = vst.msk [vmem:[%s2762_s4 + $0x8] sm:$0xff] %vm1573_vm1, %v1566_v39  ;;  %v1556_v2 = vpop.xlane.xlu0 %1555 }
 0xad0   :  { %v1569_v50 = vadd.f32 %v1564_v27, %v1556_v2 }
 0xad1   :  { %v1558_v7 = vpop.xlane.xlu1 %1557 }
 0xad2   :  { %1578 = vst.msk [vmem:[%s2762_s4 + $0x20] sm:$0xff] %vm1573_vm1, %v1569_v50  ;;  %v1570_v11 = vadd.f32 %v1564_v27, %v1558_v7 }
 0xad3   :  { %v1560_v47 = vpop.xlane.xlu0 %1559 }
 0xad4   :  { %1579 = vst.msk [vmem:[%s2762_s4 + $0x28] sm:$0xff] %vm1573_vm1, %v1570_v11  ;;  %v1571_v55 = vadd.f32 %v1564_v27, %v1560_v47 }
 0xad5   :  { %v1562_v53 = vpop.xlane.xlu1 %1561 }
 0xad6   :  { %1580 = vst.msk [vmem:[%s2762_s4 + $0x30] sm:$0xff] %vm1573_vm1, %v1571_v55  ;;  %v1572_v51 = vadd.f32 %v1564_v27, %v1562_v53 }
 0xad8   :  { %1581 = vst.msk [vmem:[%s2762_s4 + $0x38] sm:$0xff] %vm1573_vm1, %v1572_v51 }
 0xad9   :  { %1586 = vsyncpa [#allocation4], 1 }
 0xada   :  { %1587 = vsyncpa [#allocation6], 1 }
 0xadb   :  { %1588 = vsyncpa [#allocation9], 1 }

</bundles_post_ra>
